<compile_context>
chip_gen: v6e
topology: v6e:2x2x1
jax: 0.10.0
libtpu: 0.0.40
codegen_flags: <defaults>
</compile_context>

<pallas_src>
import functools
import math
from types import SimpleNamespace

import jax
import jax.numpy as jnp
from jax.experimental import pallas as pl
from jax.experimental.pallas import tpu as pltpu

SCALE = math.sqrt(0.5)  # matches torch.sqrt(torch.FloatTensor([0.5]))

# Scoped-VMEM budget for the fused stack kernels (safe on v5e/v6e/v7x: below
# every chip's physical VMEM, above the 16/32 MiB defaults).  Tune per chip.
VMEM_LIMIT_BYTES = 48 * 1024 * 1024


def _round_up(x, m):
    return ((x + m - 1) // m) * m


# ----------------------------------------------------------------------------
# Pallas kernels
# ----------------------------------------------------------------------------
def _linear_kernel(x_ref, w_ref, b_ref, o_ref):
    # o = x @ w + b ; x: [bm, K] (bf16), w: [K, bn] (bf16), b: [1, bn] (f32)
    o_ref[...] = (
        jnp.dot(x_ref[...], w_ref[...], preferred_element_type=jnp.float32)
        + b_ref[...]
    ).astype(o_ref.dtype)


def _enc_stack_kernel(emb_ref, we2h_ref, be2h_ref, cw_ref, cb_ref,
                      wh2e_ref, bh2e_ref,
                      conved_ref, combined_ref,
                      xpad_ref,
                      *, B, L, H, E, K, PAD, OFF, ROWS):
    # Fused encoder: emb2hid prologue, conv/GLU stack, hid2emb + combine epilogue.
    # grid axis 0 = layer (arbitrary / sequential).
    # xpad_ref: VMEM scratch [B*ROWS, H] f32.  Batch b occupies rows
    # [b*ROWS, (b+1)*ROWS); the live sequence sits at rows OFF..OFF+L-1 (OFF is
    # 8-aligned), with zero conv padding at OFF-PAD..OFF-1 and OFF+L..OFF+L+PAD-1.
    layer = pl.program_id(0)
    n_layers = pl.num_programs(0)
    Mr = (B - 1) * ROWS + L          # folded matmul M (covers all valid rows)
    base = OFF - PAD                 # tap-0 read offset inside each batch block

    @pl.when(layer == 0)
    def _prologue():
        xpad_ref[...] = jnp.zeros(xpad_ref.shape, jnp.float32)
        we2h = we2h_ref[...]
        be2h = be2h_ref[...]
        for b in range(B):           # one-time scatter into the padded layout
            eb = emb_ref[b * L:(b + 1) * L, :].astype(jnp.bfloat16)
            xpad_ref[b * ROWS + OFF: b * ROWS + OFF + L, :] = (
                jnp.dot(eb, we2h, preferred_element_type=jnp.float32) + be2h)

    # ---- conv + GLU + residual for this layer (batch folded into matmul M) ----
    xall = xpad_ref[...]             # aligned full f32 load (residual source)
    acc = None
    for k in range(K):               # K shifted-tap matmuls, GLU halves fused to [H, 2H]
        tap = xpad_ref[base + k: base + k + Mr, :].astype(jnp.bfloat16)
        d = jnp.dot(tap, cw_ref[k], preferred_element_type=jnp.float32)
        acc = d if acc is None else acc + d
    acc = acc + cb_ref[0]            # bias folded into a single epilogue add
    glu = acc[:, :H] * jax.nn.sigmoid(acc[:, H:])     # == F.glu on channel dim

    for b in range(B):               # aligned per-batch residual update (stores only)
        r0 = b * ROWS + OFF
        res = xall[r0: r0 + L, :]
        xpad_ref[r0: r0 + L, :] = (glu[b * ROWS: b * ROWS + L, :] + res) * SCALE

    @pl.when(layer == n_layers - 1)
    def _epilogue():
        xf = xpad_ref[...].astype(jnp.bfloat16)        # final conv_input
        ce = (jnp.dot(xf, wh2e_ref[...], preferred_element_type=jnp.float32)
              + bh2e_ref[...])                          # [B*ROWS, E]
        for b in range(B):
            cv = ce[b * ROWS + OFF: b * ROWS + OFF + L, :]
            emb_b = emb_ref[b * L:(b + 1) * L, :]
            conved_ref[b * L:(b + 1) * L, :] = cv
            combined_ref[b * L:(b + 1) * L, :] = (cv + emb_b) * SCALE


def _dec_stack_kernel(emb_ref, encT_ref, encc_ref,
                      we2h_ref, be2h_ref, cw_ref, cb_ref,
                      awh2e_ref, abh2e_ref, awe2h_ref, abe2h_ref,
                      wh2e_ref, bh2e_ref,
                      out_ref,
                      xpad_ref,
                      *, B, Lt, H, E, K, OFF, ROWS, pad_val):
    # Fused decoder: emb2hid prologue, per-layer (causal conv + GLU + attention +
    # residual), hid2emb epilogue.  grid axis 0 = layer (arbitrary).
    # xpad_ref: VMEM scratch [B*ROWS, H] f32; rows OFF-(K-1)..OFF-1 of each batch
    # block stay filled with trg_pad_idx (the PyTorch reference pads the
    # hidden-space conv input with trg_pad_idx every layer -- kept verbatim).
    layer = pl.program_id(0)
    n_layers = pl.num_programs(0)
    PADL = K - 1
    Mr = (B - 1) * ROWS + Lt
    base = OFF - PADL

    @pl.when(layer == 0)
    def _prologue():
        xpad_ref[...] = jnp.full(xpad_ref.shape, pad_val, jnp.float32)
        we2h = we2h_ref[...]
        be2h = be2h_ref[...]
        for b in range(B):
            eb = emb_ref[b * Lt:(b + 1) * Lt, :].astype(jnp.bfloat16)
            xpad_ref[b * ROWS + OFF: b * ROWS + OFF + Lt, :] = (
                jnp.dot(eb, we2h, preferred_element_type=jnp.float32) + be2h)

    # ---- causal conv + GLU (batch folded into matmul M) ----
    xall = xpad_ref[...]
    acc = None
    for k in range(K):
        tap = xpad_ref[base + k: base + k + Mr, :].astype(jnp.bfloat16)
        d = jnp.dot(tap, cw_ref[k], preferred_element_type=jnp.float32)
        acc = d if acc is None else acc + d
    acc = acc + cb_ref[0]
    glu = acc[:, :H] * jax.nn.sigmoid(acc[:, H:])        # [Mr, H] f32

    # ---- attention: hid->emb projection folded across batch ----
    ce = (jnp.dot(glu.astype(jnp.bfloat16), awh2e_ref[...],
                  preferred_element_type=jnp.float32) + abh2e_ref[...])  # [Mr, E]
    awe2h = awe2h_ref[...]
    abe2h = abe2h_ref[...]

    for b in range(B):   # per-b only where attention needs per-batch encoder tensors
        g_b = glu[b * ROWS: b * ROWS + Lt, :]            # [Lt, H] (aligned slice)
        ce_b = ce[b * ROWS: b * ROWS + Lt, :]            # [Lt, E]
        emb_b = emb_ref[b * Lt:(b + 1) * Lt, :]          # [Lt, E] f32
        comb = (ce_b + emb_b) * SCALE
        energy = jnp.dot(comb.astype(jnp.bfloat16), encT_ref[b],
                         preferred_element_type=jnp.float32)   # [Lt, Ls]
        energy = energy - jnp.max(energy, axis=-1, keepdims=True)
        p = jnp.exp(energy)
        attn = p * pl.reciprocal(jnp.sum(p, axis=-1, keepdims=True), approx=True)
        att = jnp.dot(attn.astype(jnp.bfloat16), encc_ref[b],
                      preferred_element_type=jnp.float32)      # [Lt, E]
        att_h = (jnp.dot(att.astype(jnp.bfloat16), awe2h,
                         preferred_element_type=jnp.float32) + abe2h)   # [Lt, H]
        att_comb = (g_b + att_h) * SCALE

        r0 = b * ROWS + OFF
        res = xall[r0: r0 + Lt, :]
        xpad_ref[r0: r0 + Lt, :] = (att_comb + res) * SCALE

    @pl.when(layer == n_layers - 1)
    def _epilogue():
        xf = xpad_ref[...].astype(jnp.bfloat16)
        ce2 = (jnp.dot(xf, wh2e_ref[...], preferred_element_type=jnp.float32)
               + bh2e_ref[...])                                # [B*ROWS, E]
        for b in range(B):
            out_ref[b * Lt:(b + 1) * Lt, :] = ce2[b * ROWS + OFF: b * ROWS + OFF + Lt, :]


# ----------------------------------------------------------------------------
# pallas_call wrappers
# ----------------------------------------------------------------------------
def linear(x2d, w, b, *, tm=256, tn=512):
    """y = x @ w + b, batch folded into M, tiled over (M, N).

    Only fc_out uses this now; tn kept <= 512 so tiles fit v7x's 64 MiB VMEM
    (raise to 1024 on v5e/v6e); f32 output kept for logits fidelity.
    """
    x2d = x2d.astype(w.dtype)                       # bf16 MXU inputs
    M, Kd = x2d.shape
    _, N = w.shape
    bm = M if M < tm else tm                        # full dim when small (legal),
    bn = N if N < tn else tn                        # 8/128-multiples otherwise
    grid = (pl.cdiv(M, bm), pl.cdiv(N, bn))
    return pl.pallas_call(
        _linear_kernel,
        out_shape=jax.ShapeDtypeStruct((M, N), jnp.float32),
        grid=grid,
        in_specs=[
            pl.BlockSpec((bm, Kd), lambda i, j: (i, 0)),
            pl.BlockSpec((Kd, bn), lambda i, j: (0, j)),
            pl.BlockSpec((1, bn), lambda i, j: (0, j)),
        ],
        out_specs=pl.BlockSpec((bm, bn), lambda i, j: (i, j)),
        compiler_params=pltpu.CompilerParams(
            dimension_semantics=("parallel", "parallel")),
    )(x2d, w, b)


def enc_stack(emb2d, we2h, be2h, conv_w, conv_b, wh2e, bh2e, *, B, L, K):
    assert K % 2 == 1, "encoder kernel size must be odd (ConvS2S)"
    E = emb2d.shape[1]
    H = we2h.shape[1]
    n_layers = conv_b.shape[0]
    PAD = (K - 1) // 2
    OFF = _round_up(max(PAD, 1), 8)                 # aligned start of the sequence
    ROWS = _round_up(OFF + L + PAD, 8)              # aligned per-batch block
    kernel = functools.partial(_enc_stack_kernel, B=B, L=L, H=H, E=E, K=K,
                               PAD=PAD, OFF=OFF, ROWS=ROWS)
    return pl.pallas_call(
        kernel,
        out_shape=(jax.ShapeDtypeStruct((B * L, E), jnp.float32),   # conved
                   jax.ShapeDtypeStruct((B * L, E), jnp.float32)),  # combined
        grid=(n_layers,),
        in_specs=[
            pl.BlockSpec((B * L, E), lambda i: (0, 0)),        # embedded (resident)
            pl.BlockSpec((E, H), lambda i: (0, 0)),            # emb2hid w
            pl.BlockSpec((1, H), lambda i: (0, 0)),            # emb2hid b
            pl.BlockSpec((K, H, 2 * H), lambda i: (i, 0, 0)),  # conv w  (per layer)
            pl.BlockSpec((1, 1, 2 * H), lambda i: (i, 0, 0)),  # conv b  (per layer)
            pl.BlockSpec((H, E), lambda i: (0, 0)),            # hid2emb w
            pl.BlockSpec((1, E), lambda i: (0, 0)),            # hid2emb b
        ],
        out_specs=(pl.BlockSpec((B * L, E), lambda i: (0, 0)),
                   pl.BlockSpec((B * L, E), lambda i: (0, 0))),
        scratch_shapes=[pltpu.VMEM((B * ROWS, H), jnp.float32)],
        compiler_params=pltpu.CompilerParams(
            dimension_semantics=("arbitrary",),
            vmem_limit_bytes=VMEM_LIMIT_BYTES),
    )(emb2d, we2h, be2h, conv_w, conv_b, wh2e, bh2e)


def dec_stack(emb2d, encT, encc,
              we2h, be2h, conv_w, conv_b,
              awh2e, abh2e, awe2h, abe2h,
              wh2e, bh2e, *, B, Lt, K, pad_val):
    E = emb2d.shape[1]
    H = we2h.shape[1]
    Ls = encc.shape[1]
    n_layers = conv_b.shape[0]
    PADL = K - 1
    OFF = _round_up(max(PADL, 1), 8)
    ROWS = _round_up(OFF + Lt, 8)
    kernel = functools.partial(_dec_stack_kernel, B=B, Lt=Lt, H=H, E=E, K=K,
                               OFF=OFF, ROWS=ROWS, pad_val=pad_val)
    return pl.pallas_call(
        kernel,
        out_shape=jax.ShapeDtypeStruct((B * Lt, E), jnp.float32),   # conved (emb space)
        grid=(n_layers,),
        in_specs=[
            pl.BlockSpec((B * Lt, E), lambda i: (0, 0)),       # embedded (resident)
            pl.BlockSpec((B, E, Ls), lambda i: (0, 0, 0)),     # enc_conved^T (bf16)
            pl.BlockSpec((B, Ls, E), lambda i: (0, 0, 0)),     # enc_combined (bf16)
            pl.BlockSpec((E, H), lambda i: (0, 0)),            # emb2hid w
            pl.BlockSpec((1, H), lambda i: (0, 0)),            # emb2hid b
            pl.BlockSpec((K, H, 2 * H), lambda i: (i, 0, 0)),  # conv w  (per layer)
            pl.BlockSpec((1, 1, 2 * H), lambda i: (i, 0, 0)),  # conv b  (per layer)
            pl.BlockSpec((H, E), lambda i: (0, 0)),            # attn_hid2emb w
            pl.BlockSpec((1, E), lambda i: (0, 0)),            # attn_hid2emb b
            pl.BlockSpec((E, H), lambda i: (0, 0)),            # attn_emb2hid w
            pl.BlockSpec((1, H), lambda i: (0, 0)),            # attn_emb2hid b
            pl.BlockSpec((H, E), lambda i: (0, 0)),            # hid2emb w
            pl.BlockSpec((1, E), lambda i: (0, 0)),            # hid2emb b
        ],
        out_specs=pl.BlockSpec((B * Lt, E), lambda i: (0, 0)),
        scratch_shapes=[pltpu.VMEM((B * ROWS, H), jnp.float32)],
        compiler_params=pltpu.CompilerParams(
            dimension_semantics=("arbitrary",),
            vmem_limit_bytes=VMEM_LIMIT_BYTES),
    )(emb2d, encT, encc, we2h, be2h, conv_w, conv_b,
      awh2e, abh2e, awe2h, abe2h, wh2e, bh2e)


# ----------------------------------------------------------------------------
# Model (embeddings / layout plumbing in plain JAX, heavy math in Pallas)
# ----------------------------------------------------------------------------
def encoder_forward(p, xs, kernel_size):
    B, L = xs.shape
    assert L <= p["pos_emb"].shape[0], "source length exceeds cnn_en_max_length"
    tok = jnp.take(p["tok_emb"], xs, axis=0)               # [B, L, E] f32
    pos = p["pos_emb"][:L][None, :, :]
    embedded = (tok + pos)                                  # dropout = identity
    E = embedded.shape[-1]
    emb2d = embedded.reshape(B * L, E)

    conved, combined = enc_stack(
        emb2d, p["emb2hid_w"], p["emb2hid_b"],
        p["conv_w"], p["conv_b"], p["hid2emb_w"], p["hid2emb_b"],
        B=B, L=L, K=kernel_size)
    return conved.reshape(B, L, E), combined.reshape(B, L, E)


def decoder_forward(p, ys_in, enc_conved, enc_combined, kernel_size, pad_idx):
    B, Lt = ys_in.shape
    assert Lt <= p["pos_emb"].shape[0], "target length exceeds cnn_de_max_length"
    tok = jnp.take(p["tok_emb"], ys_in, axis=0)             # [B, Lt, E] f32
    pos = p["pos_emb"][:Lt][None, :, :]
    embedded = (tok + pos)                                   # dropout = identity
    E = embedded.shape[-1]
    emb2d = embedded.reshape(B * Lt, E)

    # Host-side layout plumbing: pre-transpose enc_conved once (no in-kernel
    # transpose) and feed bf16 into the attention matmuls.
    encT = jnp.swapaxes(enc_conved, 1, 2).astype(jnp.bfloat16)   # [B, E, Ls]
    encc = enc_combined.astype(jnp.bfloat16)                     # [B, Ls, E]

    conved_emb = dec_stack(
        emb2d, encT, encc,
        p["emb2hid_w"], p["emb2hid_b"], p["conv_w"], p["conv_b"],
        p["attn_hid2emb_w"], p["attn_hid2emb_b"],
        p["attn_emb2hid_w"], p["attn_emb2hid_b"],
        p["hid2emb_w"], p["hid2emb_b"],
        B=B, Lt=Lt, K=kernel_size, pad_val=float(pad_idx))       # [B*Lt, E]

    output = linear(conved_emb, p["fc_out_w"], p["fc_out_b"])    # [B*Lt, V]
    V = p["fc_out_w"].shape[1]
    return output.reshape(B, Lt, V)


def model_graph_forward(params, cfg, xs, x_lens, ys):
    # training-branch forward (teacher forcing); x_lens is unused, as in PyTorch.
    del x_lens
    B = xs.shape[0]
    enc_conved, enc_combined = encoder_forward(params["encoder"], xs, cfg.kernel_size)
    start = jnp.full((B, 1), cfg.BOS_IDX, dtype=ys.dtype)
    ys_in = jnp.concatenate([start, ys], axis=1)[:, :-1]
    return decoder_forward(
        params["decoder"], ys_in, enc_conved, enc_combined,
        cfg.kernel_size, cfg.PAD_IDX,
    )


# ----------------------------------------------------------------------------
# Deterministic synthetic parameter init.
# Conv1d weights are stored per-tap with the two GLU halves fused on the
# output (lane) dim:  conv_w[l*K + k] == [W_l[:H, :, k].T | W_l[H:, :, k].T]
# of shape [H_in, 2H_out];  conv_b[l] of shape [1, 2H].
# ----------------------------------------------------------------------------
def _nrm(key, shape, dtype=jnp.float32, scale=0.1):
    return (scale * jax.random.normal(key, shape)).astype(dtype)


def init_params(key, cfg):
    K = cfg.kernel_size
    emb, eh, dh = cfg.embedding_size, cfg.en_hidden_size, cfg.de_hidden_size
    bf = jnp.bfloat16
    ks = list(jax.random.split(key, 32))

    enc = {
        "tok_emb": _nrm(ks[0], (cfg.src_vocab_size, emb)),
        "pos_emb": _nrm(ks[1], (cfg.cnn_en_max_length, emb)),
        "emb2hid_w": _nrm(ks[2], (emb, eh), bf),
        "emb2hid_b": _nrm(ks[3], (1, eh), scale=0.02),
        "hid2emb_w": _nrm(ks[4], (eh, emb), bf),
        "hid2emb_b": _nrm(ks[5], (1, emb), scale=0.02),
        "conv_w": _nrm(ks[6], (cfg.cnn_en_num_layers * K, eh, 2 * eh), bf),
        "conv_b": _nrm(ks[7], (cfg.cnn_en_num_layers, 1, 2 * eh), scale=0.02),
    }
    dec = {
        "tok_emb": _nrm(ks[10], (cfg.tgt_vocab_size, emb)),
        "pos_emb": _nrm(ks[11], (cfg.cnn_de_max_length, emb)),
        "emb2hid_w": _nrm(ks[12], (emb, dh), bf),
        "emb2hid_b": _nrm(ks[13], (1, dh), scale=0.02),
        "hid2emb_w": _nrm(ks[14], (dh, emb), bf),
        "hid2emb_b": _nrm(ks[15], (1, emb), scale=0.02),
        "attn_hid2emb_w": _nrm(ks[16], (dh, emb), bf),
        "attn_hid2emb_b": _nrm(ks[17], (1, emb), scale=0.02),
        "attn_emb2hid_w": _nrm(ks[18], (emb, dh), bf),
        "attn_emb2hid_b": _nrm(ks[19], (1, dh), scale=0.02),
        "fc_out_w": _nrm(ks[20], (emb, cfg.tgt_vocab_size), bf),
        "fc_out_b": _nrm(ks[21], (1, cfg.tgt_vocab_size), scale=0.02),
        "conv_w": _nrm(ks[22], (cfg.cnn_de_num_layers * K, dh, 2 * dh), bf),
        "conv_b": _nrm(ks[23], (cfg.cnn_de_num_layers, 1, 2 * dh), scale=0.02),
    }
    return {"encoder": enc, "decoder": dec}


# ----------------------------------------------------------------------------
if __name__ == "__main__":
    cfg = SimpleNamespace(
        src_vocab_size=20,
        tgt_vocab_size=24,
        embedding_size=32,
        en_hidden_size=32,
        de_hidden_size=32,
        cnn_en_num_layers=2,
        cnn_de_num_layers=2,
        kernel_size=3,
        en_drop_rate=0.0,
        de_drop_rate=0.0,
        cnn_en_max_length=16,
        cnn_de_max_length=16,
        PAD_IDX=0,
        BOS_IDX=1,
        device=None,
    )

    B, Ls, Lt = 2, 10, 8
    root = jax.random.PRNGKey(0)
    kp, kx, ky = jax.random.split(root, 3)

    params = init_params(kp, cfg)
    xs = jax.random.randint(kx, (B, Ls), 0, cfg.src_vocab_size, dtype=jnp.int32)
    ys = jax.random.randint(ky, (B, Lt), 0, cfg.tgt_vocab_size, dtype=jnp.int32)
    x_lens = jnp.full((B,), Ls, dtype=jnp.int32)

    @jax.jit
    def fwd(params, xs, x_lens, ys):
        return model_graph_forward(params, cfg, xs, x_lens, ys)

    out = fwd(params, xs, x_lens, ys)
    out = jax.block_until_ready(out)

    assert out.shape == (B, Lt, cfg.tgt_vocab_size), out.shape
    assert bool(jnp.all(jnp.isfinite(out)))
    print("KERNEL_OK")
</pallas_src>

<mosaic_0001>
module attributes {stable_mosaic.version = 11 : i64} {
  func.func @_enc_stack_kernel(%arg0: i32, %arg1: memref<20x32xf32, #tpu.memory_space<vmem>>, %arg2: memref<32x32xbf16, #tpu.memory_space<vmem>>, %arg3: memref<1x32xf32, #tpu.memory_space<vmem>>, %arg4: memref<3x32x64xbf16, #tpu.memory_space<vmem>>, %arg5: memref<1x1x64xf32, #tpu.memory_space<vmem>>, %arg6: memref<32x32xbf16, #tpu.memory_space<vmem>>, %arg7: memref<1x32xf32, #tpu.memory_space<vmem>>, %arg8: memref<20x32xf32, #tpu.memory_space<vmem>>, %arg9: memref<20x32xf32, #tpu.memory_space<vmem>>, %arg10: memref<48x32xf32, #tpu.memory_space<vmem>>) attributes {dimension_semantics = [#tpu.dimension_semantics<arbitrary>], iteration_bounds = array<i64: 2>, scalar_prefetch = 0 : i64, scratch_operands = 1 : i64, tpu.core_type = #tpu.core_type<tc>, window_params = [{pipeline_mode = #tpu.pipeline_mode<synchronous>, transform_indices = @transform_0, window_bounds = array<i64: 20, 32>}, {pipeline_mode = #tpu.pipeline_mode<synchronous>, transform_indices = @transform_1, window_bounds = array<i64: 32, 32>}, {pipeline_mode = #tpu.pipeline_mode<synchronous>, transform_indices = @transform_2, window_bounds = array<i64: 1, 32>}, {transform_indices = @transform_3, window_bounds = array<i64: 3, 32, 64>}, {transform_indices = @transform_4, window_bounds = array<i64: 1, 1, 64>}, {pipeline_mode = #tpu.pipeline_mode<synchronous>, transform_indices = @transform_5, window_bounds = array<i64: 32, 32>}, {pipeline_mode = #tpu.pipeline_mode<synchronous>, transform_indices = @transform_6, window_bounds = array<i64: 1, 32>}, {pipeline_mode = #tpu.pipeline_mode<synchronous>, transform_indices = @transform_7, window_bounds = array<i64: 20, 32>}, {pipeline_mode = #tpu.pipeline_mode<synchronous>, transform_indices = @transform_8, window_bounds = array<i64: 20, 32>}]} {
    %c0_i32 = arith.constant 0 : i32
    %0 = arith.cmpi eq, %arg0, %c0_i32 : i32
    %1 = arith.extui %0 : i1 to i32
    %c0_i32_0 = arith.constant 0 : i32
    %2 = arith.cmpi ne, %1, %c0_i32_0 : i32
    scf.if %2 {
      %cst_24 = arith.constant 0.000000e+00 : f32
      %48 = vector.broadcast %cst_24 : f32 to vector<48x32xf32>
      %c0_25 = arith.constant 0 : index
      %c0_26 = arith.constant 0 : index
      %49 = vector.load %arg10[%c0_25, %c0_26] : memref<48x32xf32, #tpu.memory_space<vmem>>, vector<48x32xf32>
      tpu.vector_store %arg10[%c0_25, %c0_26], %48 {strides = array<i32>} : memref<48x32xf32, #tpu.memory_space<vmem>>, vector<48x32xf32>,
      %c0_27 = arith.constant 0 : index
      %c0_28 = arith.constant 0 : index
      %50 = vector.load %arg2[%c0_27, %c0_28] : memref<32x32xbf16, #tpu.memory_space<vmem>>, vector<32x32xbf16>
      %c0_29 = arith.constant 0 : index
      %c0_30 = arith.constant 0 : index
      %51 = vector.load %arg3[%c0_29, %c0_30] : memref<1x32xf32, #tpu.memory_space<vmem>>, vector<1x32xf32>
      %c0_31 = arith.constant 0 : index
      %c0_32 = arith.constant 0 : index
      %52 = vector.load %arg1[%c0_31, %c0_32] : memref<20x32xf32, #tpu.memory_space<vmem>>, vector<10x32xf32>
      %53 = arith.truncf %52 : vector<10x32xf32> to vector<10x32xbf16>
      %cst_33 = arith.constant dense<0.000000e+00> : vector<10x32xf32>
      %54 = tpu.matmul %53, %50, %cst_33 {dimension_numbers = #tpu.dot_dimension_numbers<[1], [0], [0], [1], [0, 0, 1, 1], [], []>} : vector<10x32xbf16>, vector<32x32xbf16>, vector<10x32xf32> -> vector<10x32xf32>
      %55 = vector.broadcast %51 : vector<1x32xf32> to vector<10x32xf32>
      %56 = arith.addf %54, %55 : vector<10x32xf32>
      %c8_34 = arith.constant 8 : index
      %c0_35 = arith.constant 0 : index
      %57 = vector.load %arg10[%c8_34, %c0_35] : memref<48x32xf32, #tpu.memory_space<vmem>>, vector<10x32xf32>
      tpu.vector_store %arg10[%c8_34, %c0_35], %56 {strides = array<i32>} : memref<48x32xf32, #tpu.memory_space<vmem>>, vector<10x32xf32>,
      %c10 = arith.constant 10 : index
      %c0_36 = arith.constant 0 : index
      %58 = vector.load %arg1[%c10, %c0_36] : memref<20x32xf32, #tpu.memory_space<vmem>>, vector<10x32xf32>
      %59 = arith.truncf %58 : vector<10x32xf32> to vector<10x32xbf16>
      %cst_37 = arith.constant dense<0.000000e+00> : vector<10x32xf32>
      %60 = tpu.matmul %59, %50, %cst_37 {dimension_numbers = #tpu.dot_dimension_numbers<[1], [0], [0], [1], [0, 0, 1, 1], [], []>} : vector<10x32xbf16>, vector<32x32xbf16>, vector<10x32xf32> -> vector<10x32xf32>
      %61 = vector.broadcast %51 : vector<1x32xf32> to vector<10x32xf32>
      %62 = arith.addf %60, %61 : vector<10x32xf32>
      %c32_38 = arith.constant 32 : index
      %c0_39 = arith.constant 0 : index
      %63 = vector.load %arg10[%c32_38, %c0_39] : memref<48x32xf32, #tpu.memory_space<vmem>>, vector<10x32xf32>
      tpu.vector_store %arg10[%c32_38, %c0_39], %62 {strides = array<i32>} : memref<48x32xf32, #tpu.memory_space<vmem>>, vector<10x32xf32>,
    } else {
    }
    %c0 = arith.constant 0 : index
    %c0_1 = arith.constant 0 : index
    %3 = vector.load %arg10[%c0, %c0_1] : memref<48x32xf32, #tpu.memory_space<vmem>>, vector<48x32xf32>
    %c7 = arith.constant 7 : index
    %c0_2 = arith.constant 0 : index
    %4 = vector.load %arg10[%c7, %c0_2] : memref<48x32xf32, #tpu.memory_space<vmem>>, vector<34x32xf32>
    %5 = arith.truncf %4 : vector<34x32xf32> to vector<34x32xbf16>
    %c0_3 = arith.constant 0 : index
    %c0_4 = arith.constant 0 : index
    %c0_5 = arith.constant 0 : index
    %6 = vector.load %arg4[%c0_3, %c0_4, %c0_5] : memref<3x32x64xbf16, #tpu.memory_space<vmem>>, vector<1x32x64xbf16>
    %7 = vector.shape_cast %6 : vector<1x32x64xbf16> to vector<32x64xbf16>
    %cst = arith.constant dense<0.000000e+00> : vector<34x64xf32>
    %8 = tpu.matmul %5, %7, %cst {dimension_numbers = #tpu.dot_dimension_numbers<[1], [0], [0], [1], [0, 0, 1, 1], [], []>} : vector<34x32xbf16>, vector<32x64xbf16>, vector<34x64xf32> -> vector<34x64xf32>
    %c8 = arith.constant 8 : index
    %c0_6 = arith.constant 0 : index
    %9 = vector.load %arg10[%c8, %c0_6] : memref<48x32xf32, #tpu.memory_space<vmem>>, vector<34x32xf32>
    %10 = arith.truncf %9 : vector<34x32xf32> to vector<34x32xbf16>
    %c1 = arith.constant 1 : index
    %c0_7 = arith.constant 0 : index
    %c0_8 = arith.constant 0 : index
    %11 = vector.load %arg4[%c1, %c0_7, %c0_8] : memref<3x32x64xbf16, #tpu.memory_space<vmem>>, vector<1x32x64xbf16>
    %12 = vector.shape_cast %11 : vector<1x32x64xbf16> to vector<32x64xbf16>
    %cst_9 = arith.constant dense<0.000000e+00> : vector<34x64xf32>
    %13 = tpu.matmul %10, %12, %cst_9 {dimension_numbers = #tpu.dot_dimension_numbers<[1], [0], [0], [1], [0, 0, 1, 1], [], []>} : vector<34x32xbf16>, vector<32x64xbf16>, vector<34x64xf32> -> vector<34x64xf32>
    %14 = arith.addf %8, %13 : vector<34x64xf32>
    %c9 = arith.constant 9 : index
    %c0_10 = arith.constant 0 : index
    %15 = vector.load %arg10[%c9, %c0_10] : memref<48x32xf32, #tpu.memory_space<vmem>>, vector<34x32xf32>
    %16 = arith.truncf %15 : vector<34x32xf32> to vector<34x32xbf16>
    %c2 = arith.constant 2 : index
    %c0_11 = arith.constant 0 : index
    %c0_12 = arith.constant 0 : index
    %17 = vector.load %arg4[%c2, %c0_11, %c0_12] : memref<3x32x64xbf16, #tpu.memory_space<vmem>>, vector<1x32x64xbf16>
    %18 = vector.shape_cast %17 : vector<1x32x64xbf16> to vector<32x64xbf16>
    %cst_13 = arith.constant dense<0.000000e+00> : vector<34x64xf32>
    %19 = tpu.matmul %16, %18, %cst_13 {dimension_numbers = #tpu.dot_dimension_numbers<[1], [0], [0], [1], [0, 0, 1, 1], [], []>} : vector<34x32xbf16>, vector<32x64xbf16>, vector<34x64xf32> -> vector<34x64xf32>
    %20 = arith.addf %14, %19 : vector<34x64xf32>
    %c0_14 = arith.constant 0 : index
    %c0_15 = arith.constant 0 : index
    %c0_16 = arith.constant 0 : index
    %21 = vector.load %arg5[%c0_14, %c0_15, %c0_16] : memref<1x1x64xf32, #tpu.memory_space<vmem>>, vector<1x1x64xf32>
    %22 = vector.shape_cast %21 : vector<1x1x64xf32> to vector<1x64xf32>
    %23 = vector.broadcast %22 : vector<1x64xf32> to vector<34x64xf32>
    %24 = arith.addf %20, %23 : vector<34x64xf32>
    %25 = vector.extract_strided_slice %24 {offsets = [0, 0], sizes = [34, 32], strides = [1, 1]} : vector<34x64xf32> to vector<34x32xf32>
    %26 = vector.extract_strided_slice %24 {offsets = [0, 32], sizes = [34, 32], strides = [1, 1]} : vector<34x64xf32> to vector<34x32xf32>
    %27 = arith.negf %26 : vector<34x32xf32>
    %28 = math.exp %27 : vector<34x32xf32>
    %cst_17 = arith.constant 1.000000e+00 : f32
    %29 = vector.broadcast %cst_17 : f32 to vector<34x32xf32>
    %30 = arith.addf %29, %28 : vector<34x32xf32>
    %31 = arith.divf %29, %30 : vector<34x32xf32>
    %32 = arith.mulf %25, %31 : vector<34x32xf32>
    %33 = vector.extract_strided_slice %3 {offsets = [8, 0], sizes = [10, 32], strides = [1, 1]} : vector<48x32xf32> to vector<10x32xf32>
    %34 = vector.extract_strided_slice %32 {offsets = [0, 0], sizes = [10, 32], strides = [1, 1]} : vector<34x32xf32> to vector<10x32xf32>
    %35 = arith.addf %34, %33 : vector<10x32xf32>
    %cst_18 = arith.constant 0.707106769 : f32
    %36 = vector.broadcast %cst_18 : f32 to vector<10x32xf32>
    %37 = arith.mulf %35, %36 : vector<10x32xf32>
    %c8_19 = arith.constant 8 : index
    %c0_20 = arith.constant 0 : index
    %38 = vector.load %arg10[%c8_19, %c0_20] : memref<48x32xf32, #tpu.memory_space<vmem>>, vector<10x32xf32>
    tpu.vector_store %arg10[%c8_19, %c0_20], %37 {strides = array<i32>} : memref<48x32xf32, #tpu.memory_space<vmem>>, vector<10x32xf32>,
    %39 = vector.extract_strided_slice %3 {offsets = [32, 0], sizes = [10, 32], strides = [1, 1]} : vector<48x32xf32> to vector<10x32xf32>
    %40 = vector.extract_strided_slice %32 {offsets = [24, 0], sizes = [10, 32], strides = [1, 1]} : vector<34x32xf32> to vector<10x32xf32>
    %41 = arith.addf %40, %39 : vector<10x32xf32>
    %cst_21 = arith.constant 0.707106769 : f32
    %42 = vector.broadcast %cst_21 : f32 to vector<10x32xf32>
    %43 = arith.mulf %41, %42 : vector<10x32xf32>
    %c32 = arith.constant 32 : index
    %c0_22 = arith.constant 0 : index
    %44 = vector.load %arg10[%c32, %c0_22] : memref<48x32xf32, #tpu.memory_space<vmem>>, vector<10x32xf32>
    tpu.vector_store %arg10[%c32, %c0_22], %43 {strides = array<i32>} : memref<48x32xf32, #tpu.memory_space<vmem>>, vector<10x32xf32>,
    %c1_i32 = arith.constant 1 : i32
    %45 = arith.cmpi eq, %arg0, %c1_i32 : i32
    %46 = arith.extui %45 : i1 to i32
    %c0_i32_23 = arith.constant 0 : i32
    %47 = arith.cmpi ne, %46, %c0_i32_23 : i32
    scf.if %47 {
      %c0_24 = arith.constant 0 : index
      %c0_25 = arith.constant 0 : index
      %48 = vector.load %arg10[%c0_24, %c0_25] : memref<48x32xf32, #tpu.memory_space<vmem>>, vector<48x32xf32>
      %49 = arith.truncf %48 : vector<48x32xf32> to vector<48x32xbf16>
      %c0_26 = arith.constant 0 : index
      %c0_27 = arith.constant 0 : index
      %50 = vector.load %arg6[%c0_26, %c0_27] : memref<32x32xbf16, #tpu.memory_space<vmem>>, vector<32x32xbf16>
      %cst_28 = arith.constant dense<0.000000e+00> : vector<48x32xf32>
      %51 = tpu.matmul %49, %50, %cst_28 {dimension_numbers = #tpu.dot_dimension_numbers<[1], [0], [0], [1], [0, 0, 1, 1], [], []>} : vector<48x32xbf16>, vector<32x32xbf16>, vector<48x32xf32> -> vector<48x32xf32>
      %c0_29 = arith.constant 0 : index
      %c0_30 = arith.constant 0 : index
      %52 = vector.load %arg7[%c0_29, %c0_30] : memref<1x32xf32, #tpu.memory_space<vmem>>, vector<1x32xf32>
      %53 = vector.broadcast %52 : vector<1x32xf32> to vector<48x32xf32>
      %54 = arith.addf %51, %53 : vector<48x32xf32>
      %55 = vector.extract_strided_slice %54 {offsets = [8, 0], sizes = [10, 32], strides = [1, 1]} : vector<48x32xf32> to vector<10x32xf32>
      %c0_31 = arith.constant 0 : index
      %c0_32 = arith.constant 0 : index
      %56 = vector.load %arg1[%c0_31, %c0_32] : memref<20x32xf32, #tpu.memory_space<vmem>>, vector<10x32xf32>
      %c0_33 = arith.constant 0 : index
      %c0_34 = arith.constant 0 : index
      %57 = vector.load %arg8[%c0_33, %c0_34] : memref<20x32xf32, #tpu.memory_space<vmem>>, vector<10x32xf32>
      tpu.vector_store %arg8[%c0_33, %c0_34], %55 {strides = array<i32>} : memref<20x32xf32, #tpu.memory_space<vmem>>, vector<10x32xf32>,
      %58 = arith.addf %55, %56 : vector<10x32xf32>
      %cst_35 = arith.constant 0.707106769 : f32
      %59 = vector.broadcast %cst_35 : f32 to vector<10x32xf32>
      %60 = arith.mulf %58, %59 : vector<10x32xf32>
      %c0_36 = arith.constant 0 : index
      %c0_37 = arith.constant 0 : index
      %61 = vector.load %arg9[%c0_36, %c0_37] : memref<20x32xf32, #tpu.memory_space<vmem>>, vector<10x32xf32>
      tpu.vector_store %arg9[%c0_36, %c0_37], %60 {strides = array<i32>} : memref<20x32xf32, #tpu.memory_space<vmem>>, vector<10x32xf32>,
      %62 = vector.extract_strided_slice %54 {offsets = [32, 0], sizes = [10, 32], strides = [1, 1]} : vector<48x32xf32> to vector<10x32xf32>
      %c10 = arith.constant 10 : index
      %c0_38 = arith.constant 0 : index
      %63 = vector.load %arg1[%c10, %c0_38] : memref<20x32xf32, #tpu.memory_space<vmem>>, vector<10x32xf32>
      %c10_39 = arith.constant 10 : index
      %c0_40 = arith.constant 0 : index
      %64 = vector.load %arg8[%c10_39, %c0_40] : memref<20x32xf32, #tpu.memory_space<vmem>>, vector<10x32xf32>
      tpu.vector_store %arg8[%c10_39, %c0_40], %62 {strides = array<i32>} : memref<20x32xf32, #tpu.memory_space<vmem>>, vector<10x32xf32>,
      %65 = arith.addf %62, %63 : vector<10x32xf32>
      %cst_41 = arith.constant 0.707106769 : f32
      %66 = vector.broadcast %cst_41 : f32 to vector<10x32xf32>
      %67 = arith.mulf %65, %66 : vector<10x32xf32>
      %c10_42 = arith.constant 10 : index
      %c0_43 = arith.constant 0 : index
      %68 = vector.load %arg9[%c10_42, %c0_43] : memref<20x32xf32, #tpu.memory_space<vmem>>, vector<10x32xf32>
      tpu.vector_store %arg9[%c10_42, %c0_43], %67 {strides = array<i32>} : memref<20x32xf32, #tpu.memory_space<vmem>>, vector<10x32xf32>,
    } else {
    }
    return
  }
  func.func @transform_0(%arg0: i32) -> (i32, i32) {
    %c0_i32 = arith.constant 0 : i32
    %c0_i32_0 = arith.constant 0 : i32
    %c0_i32_1 = arith.constant 0 : i32
    return %c0_i32, %c0_i32_0 : i32, i32
  }
  func.func @transform_1(%arg0: i32) -> (i32, i32) {
    %c0_i32 = arith.constant 0 : i32
    %c0_i32_0 = arith.constant 0 : i32
    %c0_i32_1 = arith.constant 0 : i32
    return %c0_i32, %c0_i32_0 : i32, i32
  }
  func.func @transform_2(%arg0: i32) -> (i32, i32) {
    %c0_i32 = arith.constant 0 : i32
    %c0_i32_0 = arith.constant 0 : i32
    %c0_i32_1 = arith.constant 0 : i32
    return %c0_i32, %c0_i32_0 : i32, i32
  }
  func.func @transform_3(%arg0: i32) -> (i32, i32, i32) {
    %c0_i32 = arith.constant 0 : i32
    %c0_i32_0 = arith.constant 0 : i32
    %c0_i32_1 = arith.constant 0 : i32
    return %arg0, %c0_i32, %c0_i32_0 : i32, i32, i32
  }
  func.func @transform_4(%arg0: i32) -> (i32, i32, i32) {
    %c0_i32 = arith.constant 0 : i32
    %c0_i32_0 = arith.constant 0 : i32
    %c0_i32_1 = arith.constant 0 : i32
    return %arg0, %c0_i32, %c0_i32_0 : i32, i32, i32
  }
  func.func @transform_5(%arg0: i32) -> (i32, i32) {
    %c0_i32 = arith.constant 0 : i32
    %c0_i32_0 = arith.constant 0 : i32
    %c0_i32_1 = arith.constant 0 : i32
    return %c0_i32, %c0_i32_0 : i32, i32
  }
  func.func @transform_6(%arg0: i32) -> (i32, i32) {
    %c0_i32 = arith.constant 0 : i32
    %c0_i32_0 = arith.constant 0 : i32
    %c0_i32_1 = arith.constant 0 : i32
    return %c0_i32, %c0_i32_0 : i32, i32
  }
  func.func @transform_7(%arg0: i32) -> (i32, i32) {
    %c0_i32 = arith.constant 0 : i32
    %c0_i32_0 = arith.constant 0 : i32
    %c0_i32_1 = arith.constant 0 : i32
    return %c0_i32, %c0_i32_0 : i32, i32
  }
  func.func @transform_8(%arg0: i32) -> (i32, i32) {
    %c0_i32 = arith.constant 0 : i32
    %c0_i32_0 = arith.constant 0 : i32
    %c0_i32_1 = arith.constant 0 : i32
    return %c0_i32, %c0_i32_0 : i32, i32
  }
}

module attributes {stable_mosaic.version = 11 : i64} {
  func.func @_linear_kernel(%arg0: i32, %arg1: i32, %arg2: memref<16x32xbf16, #tpu.memory_space<vmem>>, %arg3: memref<32x24xbf16, #tpu.memory_space<vmem>>, %arg4: memref<1x24xf32, #tpu.memory_space<vmem>>, %arg5: memref<16x24xf32, #tpu.memory_space<vmem>>) attributes {dimension_semantics = [#tpu.dimension_semantics<parallel>, #tpu.dimension_semantics<parallel>], iteration_bounds = array<i64: 1, 1>, scalar_prefetch = 0 : i64, scratch_operands = 0 : i64, tpu.core_type = #tpu.core_type<tc>, window_params = [{transform_indices = @transform_0, window_bounds = array<i64: 16, 32>}, {transform_indices = @transform_1, window_bounds = array<i64: 32, 24>}, {transform_indices = @transform_2, window_bounds = array<i64: 1, 24>}, {transform_indices = @transform_3, window_bounds = array<i64: 16, 24>}]} {
    %c0 = arith.constant 0 : index
    %c0_0 = arith.constant 0 : index
    %0 = vector.load %arg2[%c0, %c0_0] : memref<16x32xbf16, #tpu.memory_space<vmem>>, vector<16x32xbf16>
    %c0_1 = arith.constant 0 : index
    %c0_2 = arith.constant 0 : index
    %1 = vector.load %arg3[%c0_1, %c0_2] : memref<32x24xbf16, #tpu.memory_space<vmem>>, vector<32x24xbf16>
    %cst = arith.constant dense<0.000000e+00> : vector<16x24xf32>
    %2 = tpu.matmul %0, %1, %cst {dimension_numbers = #tpu.dot_dimension_numbers<[1], [0], [0], [1], [0, 0, 1, 1], [], []>} : vector<16x32xbf16>, vector<32x24xbf16>, vector<16x24xf32> -> vector<16x24xf32>
    %c0_3 = arith.constant 0 : index
    %c0_4 = arith.constant 0 : index
    %3 = vector.load %arg4[%c0_3, %c0_4] : memref<1x24xf32, #tpu.memory_space<vmem>>, vector<1x24xf32>
    %4 = vector.broadcast %3 : vector<1x24xf32> to vector<16x24xf32>
    %5 = arith.addf %2, %4 : vector<16x24xf32>
    %c0_5 = arith.constant 0 : index
    %c0_6 = arith.constant 0 : index
    %6 = vector.load %arg5[%c0_5, %c0_6] : memref<16x24xf32, #tpu.memory_space<vmem>>, vector<16x24xf32>
    tpu.vector_store %arg5[%c0_5, %c0_6], %5 {strides = array<i32>} : memref<16x24xf32, #tpu.memory_space<vmem>>, vector<16x24xf32>,
    return
  }
  func.func @transform_0(%arg0: i32, %arg1: i32) -> (i32, i32) {
    %c0_i32 = arith.constant 0 : i32
    %c0_i32_0 = arith.constant 0 : i32
    return %arg0, %c0_i32 : i32, i32
  }
  func.func @transform_1(%arg0: i32, %arg1: i32) -> (i32, i32) {
    %c0_i32 = arith.constant 0 : i32
    %c0_i32_0 = arith.constant 0 : i32
    return %c0_i32, %arg1 : i32, i32
  }
  func.func @transform_2(%arg0: i32, %arg1: i32) -> (i32, i32) {
    %c0_i32 = arith.constant 0 : i32
    %c0_i32_0 = arith.constant 0 : i32
    return %c0_i32, %arg1 : i32, i32
  }
  func.func @transform_3(%arg0: i32, %arg1: i32) -> (i32, i32) {
    %c0_i32 = arith.constant 0 : i32
    return %arg0, %arg1 : i32, i32
  }
}

module attributes {stable_mosaic.version = 11 : i64} {
  func.func @_dec_stack_kernel(%arg0: i32, %arg1: memref<16x32xf32, #tpu.memory_space<vmem>>, %arg2: memref<2x32x10xbf16, #tpu.memory_space<vmem>>, %arg3: memref<2x10x32xbf16, #tpu.memory_space<vmem>>, %arg4: memref<32x32xbf16, #tpu.memory_space<vmem>>, %arg5: memref<1x32xf32, #tpu.memory_space<vmem>>, %arg6: memref<3x32x64xbf16, #tpu.memory_space<vmem>>, %arg7: memref<1x1x64xf32, #tpu.memory_space<vmem>>, %arg8: memref<32x32xbf16, #tpu.memory_space<vmem>>, %arg9: memref<1x32xf32, #tpu.memory_space<vmem>>, %arg10: memref<32x32xbf16, #tpu.memory_space<vmem>>, %arg11: memref<1x32xf32, #tpu.memory_space<vmem>>, %arg12: memref<32x32xbf16, #tpu.memory_space<vmem>>, %arg13: memref<1x32xf32, #tpu.memory_space<vmem>>, %arg14: memref<16x32xf32, #tpu.memory_space<vmem>>, %arg15: memref<32x32xf32, #tpu.memory_space<vmem>>) attributes {dimension_semantics = [#tpu.dimension_semantics<arbitrary>], iteration_bounds = array<i64: 2>, scalar_prefetch = 0 : i64, scratch_operands = 1 : i64, tpu.core_type = #tpu.core_type<tc>, window_params = [{pipeline_mode = #tpu.pipeline_mode<synchronous>, transform_indices = @transform_0, window_bounds = array<i64: 16, 32>}, {pipeline_mode = #tpu.pipeline_mode<synchronous>, transform_indices = @transform_1, window_bounds = array<i64: 2, 32, 10>}, {pipeline_mode = #tpu.pipeline_mode<synchronous>, transform_indices = @transform_2, window_bounds = array<i64: 2, 10, 32>}, {pipeline_mode = #tpu.pipeline_mode<synchronous>, transform_indices = @transform_3, window_bounds = array<i64: 32, 32>}, {pipeline_mode = #tpu.pipeline_mode<synchronous>, transform_indices = @transform_4, window_bounds = array<i64: 1, 32>}, {transform_indices = @transform_5, window_bounds = array<i64: 3, 32, 64>}, {transform_indices = @transform_6, window_bounds = array<i64: 1, 1, 64>}, {pipeline_mode = #tpu.pipeline_mode<synchronous>, transform_indices = @transform_7, window_bounds = array<i64: 32, 32>}, {pipeline_mode = #tpu.pipeline_mode<synchronous>, transform_indices = @transform_8, window_bounds = array<i64: 1, 32>}, {pipeline_mode = #tpu.pipeline_mode<synchronous>, transform_indices = @transform_9, window_bounds = array<i64: 32, 32>}, {pipeline_mode = #tpu.pipeline_mode<synchronous>, transform_indices = @transform_10, window_bounds = array<i64: 1, 32>}, {pipeline_mode = #tpu.pipeline_mode<synchronous>, transform_indices = @transform_11, window_bounds = array<i64: 32, 32>}, {pipeline_mode = #tpu.pipeline_mode<synchronous>, transform_indices = @transform_12, window_bounds = array<i64: 1, 32>}, {pipeline_mode = #tpu.pipeline_mode<synchronous>, transform_indices = @transform_13, window_bounds = array<i64: 16, 32>}]} {
    %c0_i32 = arith.constant 0 : i32
    %0 = arith.cmpi eq, %arg0, %c0_i32 : i32
    %1 = arith.extui %0 : i1 to i32
    %c0_i32_0 = arith.constant 0 : i32
    %2 = arith.cmpi ne, %1, %c0_i32_0 : i32
    scf.if %2 {
      %cst_63 = arith.constant 0.000000e+00 : f32
      %116 = vector.broadcast %cst_63 : f32 to vector<32x32xf32>
      %c0_64 = arith.constant 0 : index
      %c0_65 = arith.constant 0 : index
      %117 = vector.load %arg15[%c0_64, %c0_65] : memref<32x32xf32, #tpu.memory_space<vmem>>, vector<32x32xf32>
      tpu.vector_store %arg15[%c0_64, %c0_65], %116 {strides = array<i32>} : memref<32x32xf32, #tpu.memory_space<vmem>>, vector<32x32xf32>,
      %c0_66 = arith.constant 0 : index
      %c0_67 = arith.constant 0 : index
      %118 = vector.load %arg4[%c0_66, %c0_67] : memref<32x32xbf16, #tpu.memory_space<vmem>>, vector<32x32xbf16>
      %c0_68 = arith.constant 0 : index
      %c0_69 = arith.constant 0 : index
      %119 = vector.load %arg5[%c0_68, %c0_69] : memref<1x32xf32, #tpu.memory_space<vmem>>, vector<1x32xf32>
      %c0_70 = arith.constant 0 : index
      %c0_71 = arith.constant 0 : index
      %120 = vector.load %arg1[%c0_70, %c0_71] : memref<16x32xf32, #tpu.memory_space<vmem>>, vector<8x32xf32>
      %121 = arith.truncf %120 : vector<8x32xf32> to vector<8x32xbf16>
      %cst_72 = arith.constant dense<0.000000e+00> : vector<8x32xf32>
      %122 = tpu.matmul %121, %118, %cst_72 {dimension_numbers = #tpu.dot_dimension_numbers<[1], [0], [0], [1], [0, 0, 1, 1], [], []>} : vector<8x32xbf16>, vector<32x32xbf16>, vector<8x32xf32> -> vector<8x32xf32>
      %123 = vector.broadcast %119 : vector<1x32xf32> to vector<8x32xf32>
      %124 = arith.addf %122, %123 : vector<8x32xf32>
      %c8_73 = arith.constant 8 : index
      %c0_74 = arith.constant 0 : index
      %125 = vector.load %arg15[%c8_73, %c0_74] : memref<32x32xf32, #tpu.memory_space<vmem>>, vector<8x32xf32>
      tpu.vector_store %arg15[%c8_73, %c0_74], %124 {strides = array<i32>} : memref<32x32xf32, #tpu.memory_space<vmem>>, vector<8x32xf32>,
      %c8_75 = arith.constant 8 : index
      %c0_76 = arith.constant 0 : index
      %126 = vector.load %arg1[%c8_75, %c0_76] : memref<16x32xf32, #tpu.memory_space<vmem>>, vector<8x32xf32>
      %127 = arith.truncf %126 : vector<8x32xf32> to vector<8x32xbf16>
      %cst_77 = arith.constant dense<0.000000e+00> : vector<8x32xf32>
      %128 = tpu.matmul %127, %118, %cst_77 {dimension_numbers = #tpu.dot_dimension_numbers<[1], [0], [0], [1], [0, 0, 1, 1], [], []>} : vector<8x32xbf16>, vector<32x32xbf16>, vector<8x32xf32> -> vector<8x32xf32>
      %129 = vector.broadcast %119 : vector<1x32xf32> to vector<8x32xf32>
      %130 = arith.addf %128, %129 : vector<8x32xf32>
      %c24_78 = arith.constant 24 : index
      %c0_79 = arith.constant 0 : index
      %131 = vector.load %arg15[%c24_78, %c0_79] : memref<32x32xf32, #tpu.memory_space<vmem>>, vector<8x32xf32>
      tpu.vector_store %arg15[%c24_78, %c0_79], %130 {strides = array<i32>} : memref<32x32xf32, #tpu.memory_space<vmem>>, vector<8x32xf32>,
    } else {
    }
    %c0 = arith.constant 0 : index
    %c0_1 = arith.constant 0 : index
    %3 = vector.load %arg15[%c0, %c0_1] : memref<32x32xf32, #tpu.memory_space<vmem>>, vector<32x32xf32>
    %c6 = arith.constant 6 : index
    %c0_2 = arith.constant 0 : index
    %4 = vector.load %arg15[%c6, %c0_2] : memref<32x32xf32, #tpu.memory_space<vmem>>, vector<24x32xf32>
    %5 = arith.truncf %4 : vector<24x32xf32> to vector<24x32xbf16>
    %c0_3 = arith.constant 0 : index
    %c0_4 = arith.constant 0 : index
    %c0_5 = arith.constant 0 : index
    %6 = vector.load %arg6[%c0_3, %c0_4, %c0_5] : memref<3x32x64xbf16, #tpu.memory_space<vmem>>, vector<1x32x64xbf16>
    %7 = vector.shape_cast %6 : vector<1x32x64xbf16> to vector<32x64xbf16>
    %cst = arith.constant dense<0.000000e+00> : vector<24x64xf32>
    %8 = tpu.matmul %5, %7, %cst {dimension_numbers = #tpu.dot_dimension_numbers<[1], [0], [0], [1], [0, 0, 1, 1], [], []>} : vector<24x32xbf16>, vector<32x64xbf16>, vector<24x64xf32> -> vector<24x64xf32>
    %c7 = arith.constant 7 : index
    %c0_6 = arith.constant 0 : index
    %9 = vector.load %arg15[%c7, %c0_6] : memref<32x32xf32, #tpu.memory_space<vmem>>, vector<24x32xf32>
    %10 = arith.truncf %9 : vector<24x32xf32> to vector<24x32xbf16>
    %c1 = arith.constant 1 : index
    %c0_7 = arith.constant 0 : index
    %c0_8 = arith.constant 0 : index
    %11 = vector.load %arg6[%c1, %c0_7, %c0_8] : memref<3x32x64xbf16, #tpu.memory_space<vmem>>, vector<1x32x64xbf16>
    %12 = vector.shape_cast %11 : vector<1x32x64xbf16> to vector<32x64xbf16>
    %cst_9 = arith.constant dense<0.000000e+00> : vector<24x64xf32>
    %13 = tpu.matmul %10, %12, %cst_9 {dimension_numbers = #tpu.dot_dimension_numbers<[1], [0], [0], [1], [0, 0, 1, 1], [], []>} : vector<24x32xbf16>, vector<32x64xbf16>, vector<24x64xf32> -> vector<24x64xf32>
    %14 = arith.addf %8, %13 : vector<24x64xf32>
    %c8 = arith.constant 8 : index
    %c0_10 = arith.constant 0 : index
    %15 = vector.load %arg15[%c8, %c0_10] : memref<32x32xf32, #tpu.memory_space<vmem>>, vector<24x32xf32>
    %16 = arith.truncf %15 : vector<24x32xf32> to vector<24x32xbf16>
    %c2 = arith.constant 2 : index
    %c0_11 = arith.constant 0 : index
    %c0_12 = arith.constant 0 : index
    %17 = vector.load %arg6[%c2, %c0_11, %c0_12] : memref<3x32x64xbf16, #tpu.memory_space<vmem>>, vector<1x32x64xbf16>
    %18 = vector.shape_cast %17 : vector<1x32x64xbf16> to vector<32x64xbf16>
    %cst_13 = arith.constant dense<0.000000e+00> : vector<24x64xf32>
    %19 = tpu.matmul %16, %18, %cst_13 {dimension_numbers = #tpu.dot_dimension_numbers<[1], [0], [0], [1], [0, 0, 1, 1], [], []>} : vector<24x32xbf16>, vector<32x64xbf16>, vector<24x64xf32> -> vector<24x64xf32>
    %20 = arith.addf %14, %19 : vector<24x64xf32>
    %c0_14 = arith.constant 0 : index
    %c0_15 = arith.constant 0 : index
    %c0_16 = arith.constant 0 : index
    %21 = vector.load %arg7[%c0_14, %c0_15, %c0_16] : memref<1x1x64xf32, #tpu.memory_space<vmem>>, vector<1x1x64xf32>
    %22 = vector.shape_cast %21 : vector<1x1x64xf32> to vector<1x64xf32>
    %23 = vector.broadcast %22 : vector<1x64xf32> to vector<24x64xf32>
    %24 = arith.addf %20, %23 : vector<24x64xf32>
    %25 = vector.extract_strided_slice %24 {offsets = [0, 0], sizes = [24, 32], strides = [1, 1]} : vector<24x64xf32> to vector<24x32xf32>
    %26 = vector.extract_strided_slice %24 {offsets = [0, 32], sizes = [24, 32], strides = [1, 1]} : vector<24x64xf32> to vector<24x32xf32>
    %27 = arith.negf %26 : vector<24x32xf32>
    %28 = math.exp %27 : vector<24x32xf32>
    %cst_17 = arith.constant 1.000000e+00 : f32
    %29 = vector.broadcast %cst_17 : f32 to vector<24x32xf32>
    %30 = arith.addf %29, %28 : vector<24x32xf32>
    %31 = arith.divf %29, %30 : vector<24x32xf32>
    %32 = arith.mulf %25, %31 : vector<24x32xf32>
    %33 = arith.truncf %32 : vector<24x32xf32> to vector<24x32xbf16>
    %c0_18 = arith.constant 0 : index
    %c0_19 = arith.constant 0 : index
    %34 = vector.load %arg8[%c0_18, %c0_19] : memref<32x32xbf16, #tpu.memory_space<vmem>>, vector<32x32xbf16>
    %cst_20 = arith.constant dense<0.000000e+00> : vector<24x32xf32>
    %35 = tpu.matmul %33, %34, %cst_20 {dimension_numbers = #tpu.dot_dimension_numbers<[1], [0], [0], [1], [0, 0, 1, 1], [], []>} : vector<24x32xbf16>, vector<32x32xbf16>, vector<24x32xf32> -> vector<24x32xf32>
    %c0_21 = arith.constant 0 : index
    %c0_22 = arith.constant 0 : index
    %36 = vector.load %arg9[%c0_21, %c0_22] : memref<1x32xf32, #tpu.memory_space<vmem>>, vector<1x32xf32>
    %37 = vector.broadcast %36 : vector<1x32xf32> to vector<24x32xf32>
    %38 = arith.addf %35, %37 : vector<24x32xf32>
    %c0_23 = arith.constant 0 : index
    %c0_24 = arith.constant 0 : index
    %39 = vector.load %arg10[%c0_23, %c0_24] : memref<32x32xbf16, #tpu.memory_space<vmem>>, vector<32x32xbf16>
    %c0_25 = arith.constant 0 : index
    %c0_26 = arith.constant 0 : index
    %40 = vector.load %arg11[%c0_25, %c0_26] : memref<1x32xf32, #tpu.memory_space<vmem>>, vector<1x32xf32>
    %41 = vector.extract_strided_slice %32 {offsets = [0, 0], sizes = [8, 32], strides = [1, 1]} : vector<24x32xf32> to vector<8x32xf32>
    %42 = vector.extract_strided_slice %38 {offsets = [0, 0], sizes = [8, 32], strides = [1, 1]} : vector<24x32xf32> to vector<8x32xf32>
    %c0_27 = arith.constant 0 : index
    %c0_28 = arith.constant 0 : index
    %43 = vector.load %arg1[%c0_27, %c0_28] : memref<16x32xf32, #tpu.memory_space<vmem>>, vector<8x32xf32>
    %44 = arith.addf %42, %43 : vector<8x32xf32>
    %cst_29 = arith.constant 0.707106769 : f32
    %45 = vector.broadcast %cst_29 : f32 to vector<8x32xf32>
    %46 = arith.mulf %44, %45 : vector<8x32xf32>
    %47 = arith.truncf %46 : vector<8x32xf32> to vector<8x32xbf16>
    %c0_30 = arith.constant 0 : index
    %c0_31 = arith.constant 0 : index
    %c0_32 = arith.constant 0 : index
    %48 = vector.load %arg2[%c0_30, %c0_31, %c0_32] : memref<2x32x10xbf16, #tpu.memory_space<vmem>>, vector<1x32x10xbf16>
    %49 = vector.shape_cast %48 : vector<1x32x10xbf16> to vector<32x10xbf16>
    %cst_33 = arith.constant dense<0.000000e+00> : vector<8x10xf32>
    %50 = tpu.matmul %47, %49, %cst_33 {dimension_numbers = #tpu.dot_dimension_numbers<[1], [0], [0], [1], [0, 0, 1, 1], [], []>} : vector<8x32xbf16>, vector<32x10xbf16>, vector<8x10xf32> -> vector<8x10xf32>
    %cst_34 = arith.constant dense<0xFF800000> : vector<8xf32>
    %51 = vector.multi_reduction <maximumf>, %50, %cst_34 [1] : vector<8x10xf32> to vector<8xf32>
    %52 = vector.shape_cast %51 : vector<8xf32> to vector<8x1xf32>
    %53 = vector.broadcast %52 : vector<8x1xf32> to vector<8x10xf32>
    %54 = arith.subf %50, %53 : vector<8x10xf32>
    %55 = math.exp %54 : vector<8x10xf32>
    %cst_35 = arith.constant dense<0.000000e+00> : vector<8xf32>
    %56 = vector.multi_reduction <add>, %55, %cst_35 [1] : vector<8x10xf32> to vector<8xf32>
    %57 = vector.shape_cast %56 : vector<8xf32> to vector<8x1xf32>
    %58 = tpu.reciprocal %57 {approx = true} : vector<8x1xf32> -> vector<8x1xf32>
    %59 = vector.broadcast %58 : vector<8x1xf32> to vector<8x10xf32>
    %60 = arith.mulf %55, %59 : vector<8x10xf32>
    %61 = arith.truncf %60 : vector<8x10xf32> to vector<8x10xbf16>
    %c0_36 = arith.constant 0 : index
    %c0_37 = arith.constant 0 : index
    %c0_38 = arith.constant 0 : index
    %62 = vector.load %arg3[%c0_36, %c0_37, %c0_38] : memref<2x10x32xbf16, #tpu.memory_space<vmem>>, vector<1x10x32xbf16>
    %63 = vector.shape_cast %62 : vector<1x10x32xbf16> to vector<10x32xbf16>
    %cst_39 = arith.constant dense<0.000000e+00> : vector<8x32xf32>
    %64 = tpu.matmul %61, %63, %cst_39 {dimension_numbers = #tpu.dot_dimension_numbers<[1], [0], [0], [1], [0, 0, 1, 1], [], []>} : vector<8x10xbf16>, vector<10x32xbf16>, vector<8x32xf32> -> vector<8x32xf32>
    %65 = arith.truncf %64 : vector<8x32xf32> to vector<8x32xbf16>
    %cst_40 = arith.constant dense<0.000000e+00> : vector<8x32xf32>
    %66 = tpu.matmul %65, %39, %cst_40 {dimension_numbers = #tpu.dot_dimension_numbers<[1], [0], [0], [1], [0, 0, 1, 1], [], []>} : vector<8x32xbf16>, vector<32x32xbf16>, vector<8x32xf32> -> vector<8x32xf32>
    %67 = vector.broadcast %40 : vector<1x32xf32> to vector<8x32xf32>
    %68 = arith.addf %66, %67 : vector<8x32xf32>
    %69 = arith.addf %41, %68 : vector<8x32xf32>
    %cst_41 = arith.constant 0.707106769 : f32
    %70 = vector.broadcast %cst_41 : f32 to vector<8x32xf32>
    %71 = arith.mulf %69, %70 : vector<8x32xf32>
    %72 = vector.extract_strided_slice %3 {offsets = [8, 0], sizes = [8, 32], strides = [1, 1]} : vector<32x32xf32> to vector<8x32xf32>
    %73 = arith.addf %71, %72 : vector<8x32xf32>
    %cst_42 = arith.constant 0.707106769 : f32
    %74 = vector.broadcast %cst_42 : f32 to vector<8x32xf32>
    %75 = arith.mulf %73, %74 : vector<8x32xf32>
    %c8_43 = arith.constant 8 : index
    %c0_44 = arith.constant 0 : index
    %76 = vector.load %arg15[%c8_43, %c0_44] : memref<32x32xf32, #tpu.memory_space<vmem>>, vector<8x32xf32>
    tpu.vector_store %arg15[%c8_43, %c0_44], %75 {strides = array<i32>} : memref<32x32xf32, #tpu.memory_space<vmem>>, vector<8x32xf32>,
    %77 = vector.extract_strided_slice %32 {offsets = [16, 0], sizes = [8, 32], strides = [1, 1]} : vector<24x32xf32> to vector<8x32xf32>
    %78 = vector.extract_strided_slice %38 {offsets = [16, 0], sizes = [8, 32], strides = [1, 1]} : vector<24x32xf32> to vector<8x32xf32>
    %c8_45 = arith.constant 8 : index
    %c0_46 = arith.constant 0 : index
    %79 = vector.load %arg1[%c8_45, %c0_46] : memref<16x32xf32, #tpu.memory_space<vmem>>, vector<8x32xf32>
    %80 = arith.addf %78, %79 : vector<8x32xf32>
    %cst_47 = arith.constant 0.707106769 : f32
    %81 = vector.broadcast %cst_47 : f32 to vector<8x32xf32>
    %82 = arith.mulf %80, %81 : vector<8x32xf32>
    %83 = arith.truncf %82 : vector<8x32xf32> to vector<8x32xbf16>
    %c1_48 = arith.constant 1 : index
    %c0_49 = arith.constant 0 : index
    %c0_50 = arith.constant 0 : index
    %84 = vector.load %arg2[%c1_48, %c0_49, %c0_50] : memref<2x32x10xbf16, #tpu.memory_space<vmem>>, vector<1x32x10xbf16>
    %85 = vector.shape_cast %84 : vector<1x32x10xbf16> to vector<32x10xbf16>
    %cst_51 = arith.constant dense<0.000000e+00> : vector<8x10xf32>
    %86 = tpu.matmul %83, %85, %cst_51 {dimension_numbers = #tpu.dot_dimension_numbers<[1], [0], [0], [1], [0, 0, 1, 1], [], []>} : vector<8x32xbf16>, vector<32x10xbf16>, vector<8x10xf32> -> vector<8x10xf32>
    %cst_52 = arith.constant dense<0xFF800000> : vector<8xf32>
    %87 = vector.multi_reduction <maximumf>, %86, %cst_52 [1] : vector<8x10xf32> to vector<8xf32>
    %88 = vector.shape_cast %87 : vector<8xf32> to vector<8x1xf32>
    %89 = vector.broadcast %88 : vector<8x1xf32> to vector<8x10xf32>
    %90 = arith.subf %86, %89 : vector<8x10xf32>
    %91 = math.exp %90 : vector<8x10xf32>
    %cst_53 = arith.constant dense<0.000000e+00> : vector<8xf32>
    %92 = vector.multi_reduction <add>, %91, %cst_53 [1] : vector<8x10xf32> to vector<8xf32>
    %93 = vector.shape_cast %92 : vector<8xf32> to vector<8x1xf32>
    %94 = tpu.reciprocal %93 {approx = true} : vector<8x1xf32> -> vector<8x1xf32>
    %95 = vector.broadcast %94 : vector<8x1xf32> to vector<8x10xf32>
    %96 = arith.mulf %91, %95 : vector<8x10xf32>
    %97 = arith.truncf %96 : vector<8x10xf32> to vector<8x10xbf16>
    %c1_54 = arith.constant 1 : index
    %c0_55 = arith.constant 0 : index
    %c0_56 = arith.constant 0 : index
    %98 = vector.load %arg3[%c1_54, %c0_55, %c0_56] : memref<2x10x32xbf16, #tpu.memory_space<vmem>>, vector<1x10x32xbf16>
    %99 = vector.shape_cast %98 : vector<1x10x32xbf16> to vector<10x32xbf16>
    %cst_57 = arith.constant dense<0.000000e+00> : vector<8x32xf32>
    %100 = tpu.matmul %97, %99, %cst_57 {dimension_numbers = #tpu.dot_dimension_numbers<[1], [0], [0], [1], [0, 0, 1, 1], [], []>} : vector<8x10xbf16>, vector<10x32xbf16>, vector<8x32xf32> -> vector<8x32xf32>
    %101 = arith.truncf %100 : vector<8x32xf32> to vector<8x32xbf16>
    %cst_58 = arith.constant dense<0.000000e+00> : vector<8x32xf32>
    %102 = tpu.matmul %101, %39, %cst_58 {dimension_numbers = #tpu.dot_dimension_numbers<[1], [0], [0], [1], [0, 0, 1, 1], [], []>} : vector<8x32xbf16>, vector<32x32xbf16>, vector<8x32xf32> -> vector<8x32xf32>
    %103 = vector.broadcast %40 : vector<1x32xf32> to vector<8x32xf32>
    %104 = arith.addf %102, %103 : vector<8x32xf32>
    %105 = arith.addf %77, %104 : vector<8x32xf32>
    %cst_59 = arith.constant 0.707106769 : f32
    %106 = vector.broadcast %cst_59 : f32 to vector<8x32xf32>
    %107 = arith.mulf %105, %106 : vector<8x32xf32>
    %108 = vector.extract_strided_slice %3 {offsets = [24, 0], sizes = [8, 32], strides = [1, 1]} : vector<32x32xf32> to vector<8x32xf32>
    %109 = arith.addf %107, %108 : vector<8x32xf32>
    %cst_60 = arith.constant 0.707106769 : f32
    %110 = vector.broadcast %cst_60 : f32 to vector<8x32xf32>
    %111 = arith.mulf %109, %110 : vector<8x32xf32>
    %c24 = arith.constant 24 : index
    %c0_61 = arith.constant 0 : index
    %112 = vector.load %arg15[%c24, %c0_61] : memref<32x32xf32, #tpu.memory_space<vmem>>, vector<8x32xf32>
    tpu.vector_store %arg15[%c24, %c0_61], %111 {strides = array<i32>} : memref<32x32xf32, #tpu.memory_space<vmem>>, vector<8x32xf32>,
    %c1_i32 = arith.constant 1 : i32
    %113 = arith.cmpi eq, %arg0, %c1_i32 : i32
    %114 = arith.extui %113 : i1 to i32
    %c0_i32_62 = arith.constant 0 : i32
    %115 = arith.cmpi ne, %114, %c0_i32_62 : i32
    scf.if %115 {
      %c0_63 = arith.constant 0 : index
      %c0_64 = arith.constant 0 : index
      %116 = vector.load %arg15[%c0_63, %c0_64] : memref<32x32xf32, #tpu.memory_space<vmem>>, vector<32x32xf32>
      %117 = arith.truncf %116 : vector<32x32xf32> to vector<32x32xbf16>
      %c0_65 = arith.constant 0 : index
      %c0_66 = arith.constant 0 : index
      %118 = vector.load %arg12[%c0_65, %c0_66] : memref<32x32xbf16, #tpu.memory_space<vmem>>, vector<32x32xbf16>
      %cst_67 = arith.constant dense<0.000000e+00> : vector<32x32xf32>
      %119 = tpu.matmul %117, %118, %cst_67 {dimension_numbers = #tpu.dot_dimension_numbers<[1], [0], [0], [1], [0, 0, 1, 1], [], []>} : vector<32x32xbf16>, vector<32x32xbf16>, vector<32x32xf32> -> vector<32x32xf32>
      %c0_68 = arith.constant 0 : index
      %c0_69 = arith.constant 0 : index
      %120 = vector.load %arg13[%c0_68, %c0_69] : memref<1x32xf32, #tpu.memory_space<vmem>>, vector<1x32xf32>
      %121 = vector.broadcast %120 : vector<1x32xf32> to vector<32x32xf32>
      %122 = arith.addf %119, %121 : vector<32x32xf32>
      %123 = vector.extract_strided_slice %122 {offsets = [8, 0], sizes = [8, 32], strides = [1, 1]} : vector<32x32xf32> to vector<8x32xf32>
      %c0_70 = arith.constant 0 : index
      %c0_71 = arith.constant 0 : index
      %124 = vector.load %arg14[%c0_70, %c0_71] : memref<16x32xf32, #tpu.memory_space<vmem>>, vector<8x32xf32>
      tpu.vector_store %arg14[%c0_70, %c0_71], %123 {strides = array<i32>} : memref<16x32xf32, #tpu.memory_space<vmem>>, vector<8x32xf32>,
      %125 = vector.extract_strided_slice %122 {offsets = [24, 0], sizes = [8, 32], strides = [1, 1]} : vector<32x32xf32> to vector<8x32xf32>
      %c8_72 = arith.constant 8 : index
      %c0_73 = arith.constant 0 : index
      %126 = vector.load %arg14[%c8_72, %c0_73] : memref<16x32xf32, #tpu.memory_space<vmem>>, vector<8x32xf32>
      tpu.vector_store %arg14[%c8_72, %c0_73], %125 {strides = array<i32>} : memref<16x32xf32, #tpu.memory_space<vmem>>, vector<8x32xf32>,
    } else {
    }
    return
  }
  func.func @transform_0(%arg0: i32) -> (i32, i32) {
    %c0_i32 = arith.constant 0 : i32
    %c0_i32_0 = arith.constant 0 : i32
    %c0_i32_1 = arith.constant 0 : i32
    return %c0_i32, %c0_i32_0 : i32, i32
  }
  func.func @transform_1(%arg0: i32) -> (i32, i32, i32) {
    %c0_i32 = arith.constant 0 : i32
    %c0_i32_0 = arith.constant 0 : i32
    %c0_i32_1 = arith.constant 0 : i32
    %c0_i32_2 = arith.constant 0 : i32
    return %c0_i32, %c0_i32_0, %c0_i32_1 : i32, i32, i32
  }
  func.func @transform_2(%arg0: i32) -> (i32, i32, i32) {
    %c0_i32 = arith.constant 0 : i32
    %c0_i32_0 = arith.constant 0 : i32
    %c0_i32_1 = arith.constant 0 : i32
    %c0_i32_2 = arith.constant 0 : i32
    return %c0_i32, %c0_i32_0, %c0_i32_1 : i32, i32, i32
  }
  func.func @transform_3(%arg0: i32) -> (i32, i32) {
    %c0_i32 = arith.constant 0 : i32
    %c0_i32_0 = arith.constant 0 : i32
    %c0_i32_1 = arith.constant 0 : i32
    return %c0_i32, %c0_i32_0 : i32, i32
  }
  func.func @transform_4(%arg0: i32) -> (i32, i32) {
    %c0_i32 = arith.constant 0 : i32
    %c0_i32_0 = arith.constant 0 : i32
    %c0_i32_1 = arith.constant 0 : i32
    return %c0_i32, %c0_i32_0 : i32, i32
  }
  func.func @transform_5(%arg0: i32) -> (i32, i32, i32) {
    %c0_i32 = arith.constant 0 : i32
    %c0_i32_0 = arith.constant 0 : i32
    %c0_i32_1 = arith.constant 0 : i32
    return %arg0, %c0_i32, %c0_i32_0 : i32, i32, i32
  }
  func.func @transform_6(%arg0: i32) -> (i32, i32, i32) {
    %c0_i32 = arith.constant 0 : i32
    %c0_i32_0 = arith.constant 0 : i32
    %c0_i32_1 = arith.constant 0 : i32
    return %arg0, %c0_i32, %c0_i32_0 : i32, i32, i32
  }
  func.func @transform_7(%arg0: i32) -> (i32, i32) {
    %c0_i32 = arith.constant 0 : i32
    %c0_i32_0 = arith.constant 0 : i32
    %c0_i32_1 = arith.constant 0 : i32
    return %c0_i32, %c0_i32_0 : i32, i32
  }
  func.func @transform_8(%arg0: i32) -> (i32, i32) {
    %c0_i32 = arith.constant 0 : i32
    %c0_i32_0 = arith.constant 0 : i32
    %c0_i32_1 = arith.constant 0 : i32
    return %c0_i32, %c0_i32_0 : i32, i32
  }
  func.func @transform_9(%arg0: i32) -> (i32, i32) {
    %c0_i32 = arith.constant 0 : i32
    %c0_i32_0 = arith.constant 0 : i32
    %c0_i32_1 = arith.constant 0 : i32
    return %c0_i32, %c0_i32_0 : i32, i32
  }
  func.func @transform_10(%arg0: i32) -> (i32, i32) {
    %c0_i32 = arith.constant 0 : i32
    %c0_i32_0 = arith.constant 0 : i32
    %c0_i32_1 = arith.constant 0 : i32
    return %c0_i32, %c0_i32_0 : i32, i32
  }
  func.func @transform_11(%arg0: i32) -> (i32, i32) {
    %c0_i32 = arith.constant 0 : i32
    %c0_i32_0 = arith.constant 0 : i32
    %c0_i32_1 = arith.constant 0 : i32
    return %c0_i32, %c0_i32_0 : i32, i32
  }
  func.func @transform_12(%arg0: i32) -> (i32, i32) {
    %c0_i32 = arith.constant 0 : i32
    %c0_i32_0 = arith.constant 0 : i32
    %c0_i32_1 = arith.constant 0 : i32
    return %c0_i32, %c0_i32_0 : i32, i32
  }
  func.func @transform_13(%arg0: i32) -> (i32, i32) {
    %c0_i32 = arith.constant 0 : i32
    %c0_i32_0 = arith.constant 0 : i32
    %c0_i32_1 = arith.constant 0 : i32
    return %c0_i32, %c0_i32_0 : i32, i32
  }
}

</mosaic_0001>

<bundles_post_ra>
// kernel: fwd.5
= control target key start
LH: loop header
LB: loop body
LE: loop exit
PB: predicated region body
PF: predicated region fallthrough
CT: control target
= control target key end

     0   :  { %v156_v1 = vmov 0.0   ;;  %vm157_vm0 = vmmov 0   ;;  %s196_s0 = inlined_call_operand.vmem [shape: bf16[16,32], index: 0, kind: input, shape index: {}]   ;;  %s197_s1 = inlined_call_operand.vmem [shape: bf16[32,24], index: 1, kind: input, shape index: {}]   ;;  %s198_s2 = inlined_call_operand.vmem [shape: f32[1,24], index: 2, kind: input, shape index: {}]   ;;  %s199_s3 = inlined_call_operand.hbm [shape: f32[16,24], index: 3, kind: output, shape index: {}]  }
   0x1   :  { %v131_v0 = vld [vmem:[%s197_s1 + $0x8] sm:$0xff]   ;;  %118 = vmatprep.subr.bf16.mxu0 %v156_v1  ;;  %v132_v2 = vld [vmem:[%s197_s1] sm:$0xff]   ;;  %122 = vmatprep.mubr.msk.bf16.mxu0 %vm157_vm0, %v156_v1 }
   0x2   :  { %119 = vmatpush3.bf16.msra.mxu0 %v131_v0 }
   0x3   :  { %120 = vmatprep.subr.bf16.mxu0 %v156_v1 }
   0x4   :  { %8 = vsyncpa [#allocation3], 0  ;;  %v133_v3 = vld [vmem:[%s196_s0] sm:$0xff]   ;;  %vm46_vm1 = vcmask 261120   ;;  %vm91_vm2 = vcmask 195584   ;;  %s158_s20 = smov [#allocation2]  }
   0x5   :  { %v110_v4 = vld [vmem:[%s198_s2] ss:$0 sm:$0xff]  ;;  %s99_s1 = sshll.u32 %s158_s20, 4  ;;  %s100_s1 = int_to_ptr.vmem [resolvable:$true] %s99_s1 }
   0x6   :  { %121 = vmatpush3.bf16.msra.mxu0 %v132_v2  ;;  %s134_s0 = scalar_lea.vmem %s100_s1, 256  ;;  %p139_p1 = scmp.lt.s32.totalorder %s100_s1, %s100_s1 }
   0x7   :  { %p135_p0 = scmp.ne.s32.totalorder %s100_s1, %s134_s0  ;;  %p140_p2 = scmp.lt.s32.totalorder %s134_s0, %s134_s0 }
   0x9   :  { %123 = vmatmul.mubr.msk.bf16.vlgmr.msra.gmra.mxu0 %vm46_vm1, %v133_v3  ;;  %p141_p3 = por %p140_p2, %p139_p1 }
   0xb   :  { %p142_p4 = pnand %p141_p3, %p135_p0 }
  0xc9   :  { %v84_v5 = vpop.f32.mrf.mxu0 }
  0xca   :  { %v85_v6 = vadd.f32 %v110_v4, %v84_v5 }
  0xcb   :  { %v124_v7 = vpop.f32.mrf.mxu0 }
  0xcc   :  { %92 = vst.msk [vmem:[#allocation2] sm:$0xff] %vm91_vm2, %v85_v6 }
  0xcd   :  { %v87_v8 = vpop.f32.mrf.mxu0 }
  0xce   :  { %v88_v9 = vadd.f32 %v110_v4, %v87_v8 }
  0xcf   :  { %v125_v10 = vpop.f32.mrf.mxu0 }
  0xd0   :  { %93 = vst.msk [vmem:[#allocation2 + $0x8] sm:$0xff] %vm91_vm2, %v88_v9 }
  0xd1   :  { %145 = shalt.err (!%p142_p4)
}
  0xd2   :  { %s159_s2 = smov 128   ;;  %s160_s21 = smov 8  }
  0xd3   :  { %105 = dma.vmem_to_hbm [thread:$0]  %s100_s1, 256, %s199_s3, [#allocation3], %s159_s2, %s159_s2, %s160_s21  }
  0xd4   :  { %154 = dma.done.wait [#allocation3], 256  }
  0xd5   :  { %155 = vsyncadd [#allocation3], 4294967040 }
  0xd6   :  { %109 = vsyncpa [#allocation3], 1 }

// kernel: fwd.3
= control target key start
LH: loop header
LB: loop body
LE: loop exit
PB: predicated region body
PF: predicated region fallthrough
CT: control target
= control target key end

     0   :  { %s1210_s27 = smov 0   ;;  %s1371_s0 = inlined_call_operand.vmem [shape: f32[20,32], index: 0, kind: input, shape index: {}]   ;;  %s1372_s1 = inlined_call_operand.vmem [shape: bf16[32,32], index: 1, kind: input, shape index: {}]   ;;  %s1373_s2 = inlined_call_operand.vmem [shape: f32[1,32], index: 2, kind: input, shape index: {}]   ;;  %s1374_s3 = inlined_call_operand.vmem [shape: bf16[6,32,64], index: 3, kind: input, shape index: {}]   ;;  %s1375_s4 = inlined_call_operand.vmem [shape: f32[2,1,64], index: 4, kind: input, shape index: {}]   ;;  %s1376_s5 = inlined_call_operand.vmem [shape: bf16[32,32], index: 5, kind: input, shape index: {}]   ;;  %s1377_s6 = inlined_call_operand.vmem [shape: f32[1,32], index: 6, kind: input, shape index: {}]   ;;  %s1378_s7 = inlined_call_operand.vmem [shape: f32[20,32], index: 7, kind: output, shape index: {0}]   ;;  %s1379_s8 = inlined_call_operand.vmem [shape: f32[20,32], index: 8, kind: output, shape index: {1}]  }
   0x1 LB: > { %s1216_s28 = sadd.s32 4294967295, %s1156_s27   ;;  %p948_p0 = scmp.ge.s32.totalorder %s1156_s27, 1  ;;  %s1156_s27 = sphi %s1210_s27, %s19_s27  }
   0x2   : > { %p265_p1 = scmp.lt.s32.totalorder %s1156_s27, 3 }
   0x4   : > { %p266_p2 = pnand %p948_p0, %p265_p1 }
   0x5   : > { %s298_s29 = smul.u32 (!%p266_p2), 3, %s1216_s28  ;;  %p305_p3 = scmp.lt.s32.totalorder (!%p266_p2), %s1216_s28, 1 }
   0x6   : > { %269 = sbr.rel (%p266_p2) target bundleno = 842 (0x34a), region = 48  ;;  %p951_p5 = scmp.ne.s32.totalorder (!%p266_p2), %s1216_s28, 0 }
   0x7   : > { %p299_p4 = scmp.lt.s32.totalorder (!%p266_p2), %s298_s29, 5 }
   0xb   : > { %s1223_s30 = scalar_select %p305_p3, %s1216_s28, 1 }
   0xc   : > { %s1381_s29 = smov (!%p299_p4, %s298_s29), 5  ;;  %312 = sbr.rel (%p951_p5) target bundleno = 226 (0xe2), region = 52 }
   0xd   : > { %s307_s11 = scalar_lea.vmem %s1375_s4, %s1223_s30  ;;  %s994_s12 = sshll.u32 %s1381_s29, 4 }
   0xe   : > { %s1232_s15 = scalar_lea.vmem %s1374_s3, %s994_s12 }
  0x11   : > { %v1124_v0 = vld [vmem:[%s1372_s1 + $0x8] sm:$0xff]   ;;  %v1158_v1 = vmov 0.0   ;;  %v1125_v2 = vld [vmem:[%s1372_s1] sm:$0xff]   ;;  %vm313_vm0 = vcmask 261120   ;;  %v394_v6 = vld [vmem:[%s1371_s0 + $0x12] sm:$0x3] }
  0x12   : > { %1021 = vmatprep.subr.bf16.mxu0 %v1158_v1  ;;  %1029 = vmatprep.subr.bf16.mxu1 %v1158_v1  ;;  %v325_v3 = vld [vmem:[%s1371_s0] sm:$0xff]  ;;  %v326_v4 = vld [vmem:[%s1371_s0 + $0x8] sm:$0x3]  ;;  %v393_v5 = vld [vmem:[%s1371_s0 + $0xa] sm:$0xff]  ;;  %314 = vst.msk [vmem:[#allocation2] sm:$0xff] %vm313_vm0, %v1158_v1  ;;  %vm1159_vm1 = vmmov 0  }
  0x13   : > { %1022 = vmatpush3.bf16.msra.mxu0 %v1124_v0  ;;  %1030 = vmatpush3.bf16.msra.mxu1 %v1124_v0  ;;  %317 = vst.msk [vmem:[#allocation2 + $0x18] sm:$0xff] %vm313_vm0, %v1158_v1  ;;  %315 = vst.msk [vmem:[#allocation2 + $0x8] sm:$0xff] %vm313_vm0, %v1158_v1  ;;  %v327_v7 = vpack.c.bf16 %v326_v4, %v325_v3  ;;  %v395_v8 = vpack.c.bf16 %v394_v6, %v393_v5  ;;  %v952_v9 = vld [vmem:[%s1373_s2] ss:$0 sm:$0xff]  ;;  %vm391_vm2 = vcmask 254976  }
  0x14   : > { %1023 = vmatprep.subr.bf16.mxu0 %v1158_v1  ;;  %1031 = vmatprep.subr.bf16.mxu1 %v1158_v1  ;;  %316 = vst.msk [vmem:[#allocation2 + $0x10] sm:$0xff] %vm313_vm0, %v1158_v1  ;;  %318 = vst.msk [vmem:[#allocation2 + $0x20] sm:$0xff] %vm313_vm0, %v1158_v1 }
  0x15   : > { %319 = vst.msk [vmem:[#allocation2 + $0x28] sm:$0xff] %vm313_vm0, %v1158_v1  ;;  %1025 = vmatprep.mubr.msk.bf16.mxu0 %vm1159_vm1, %v1158_v1  ;;  %1033 = vmatprep.mubr.msk.bf16.mxu1 %vm1159_vm1, %v1158_v1 }
  0x17   : > { %1024 = vmatpush3.bf16.msra.mxu0 %v1125_v2  ;;  %1032 = vmatpush3.bf16.msra.mxu1 %v1125_v2 }
  0x1a   : > { %1026 = vmatmul.mubr.msk.bf16.vlgmr.msra.gmra.mxu0 %vm313_vm0, %v327_v7  ;;  %1034 = vmatmul.mubr.msk.bf16.vlgmr.msra.gmra.mxu1 %vm313_vm0, %v395_v8 }
  0xda   : > { %v383_v10 = vpop.f32.mrf.mxu0  ;;  %v433_v11 = vpop.f32.mrf.mxu1 }
  0xdb   : > { %v384_v12 = vadd.f32 %v952_v9, %v383_v10  ;;  %v434_v13 = vadd.f32 %v952_v9, %v433_v11 }
  0xdc   : > { %v1027_v14 = vpop.f32.mrf.mxu0  ;;  %v1035_v15 = vpop.f32.mrf.mxu1 }
  0xdd   : > { %390 = vst.msk [vmem:[#allocation2 + $0x8] sm:$0xff] %vm313_vm0, %v384_v12  ;;  %440 = vst.msk [vmem:[#allocation2 + $0x20] sm:$0xff] %vm313_vm0, %v434_v13 }
  0xde   : > { %v386_v16 = vpop.f32.mrf.mxu0  ;;  %v436_v17 = vpop.f32.mrf.mxu1 }
  0xdf   : > { %v387_v18 = vadd.f32 %v952_v9, %v386_v16  ;;  %v437_v19 = vadd.f32 %v952_v9, %v436_v17 }
  0xe0   : > { %v1028_v20 = vpop.f32.mrf.mxu0  ;;  %v1036_v21 = vpop.f32.mrf.mxu1 }
  0xe1   : > { %392 = vst.msk [vmem:[#allocation2 + $0x10] sm:$0x3] %vm391_vm2, %v387_v18  ;;  %441 = vst.msk [vmem:[#allocation2 + $0x28] sm:$0x3] %vm391_vm2, %v437_v19 }
  0xe2 PF: > { %v1126_v22 = vld [vmem:[%s1232_s15 + $0x18] sm:$0xff]   ;;  %v1160_v23 = vmov 0.0   ;;  %v1127_v24 = vld [vmem:[%s1232_s15 + $0x10] sm:$0xff]   ;;  %vm1161_vm3 = vmmov 0   ;;  %v1128_v30 = vld [vmem:[%s1232_s15 + $0x8] sm:$0xff]   ;;  %vm480_vm4 = vcmask 261120  }
  0xe3   : > { %1101 = vmatprep.subr.bf16.mxu1 %v1160_v23  ;;  %1037 = vmatprep.subr.bf16.mxu0 %v1160_v23  ;;  %v458_v26 = vld [vmem:[#allocation2 + $0x18] sm:$0xff]  ;;  %v1129_v32 = vld [vmem:[%s1232_s15 + $0x28] sm:$0xff]   ;;  %v1130_v34 = vld [vmem:[%s1232_s15] sm:$0xff]   ;;  %s1162_s30 = smov 96   ;;  %vm774_vm5 = vcmask 254976   ;;  %p985_p6 = scmp.ne.s32.totalorder %s1216_s28, 1 }
  0xe4   : > { %1103 = vmatpush3.bf16.msra.mxu1 %v1126_v22  ;;  %1038 = vmatpush3.bf16.msra.mxu0 %v1126_v22  ;;  %v1268_v25 = vld [vmem:[#allocation2 + $0x20] sm:$0xff]  ;;  %v1271_v27 = vld [vmem:[#allocation2 + $0x8] sm:$0xff]  ;;  %v448_v46 = vld [vmem:[#allocation2 + $0x17] sm:$0xff] }
  0xe5   : > { %1102 = vmatprep.subr.bf16.mxu1 %v1160_v23  ;;  %1045 = vmatprep.mubr.msk.bf16.mxu1 %vm1161_vm3, %v1160_v23  ;;  %v461_v29 = vpack.c.bf16 %v1268_v25, %v458_v26  ;;  %v1131_v35 = vld [vmem:[%s1232_s15 + $0x20] sm:$0xff]  }
  0xe6   : > { %1039 = vmatprep.subr.bf16.mxu0 %v1160_v23  ;;  %1041 = vmatprep.mubr.msk.bf16.mxu0 %vm1161_vm3, %v1160_v23  ;;  %v446_v40 = vld [vmem:[#allocation2 + $0x7] sm:$0xff]  ;;  %v623_v42 = vld [vmem:[#allocation2 + $0x19] sm:$0xff] }
  0xe7   : > { %v449_v47 = vld [vmem:[#allocation2 + $0x1f] sm:$0xff] }
  0xe8   : > { %v1274_v28 = vld [vmem:[#allocation2 + $0x10] sm:$0xff]  ;;  %1104 = vmatpush3.bf16.msra.mxu1 %v1127_v24  ;;  %1040 = vmatpush3.bf16.msra.mxu0 %v1127_v24  ;;  %v459_v33 = vld [vmem:[#allocation2 + $0x28] sm:$0x3]  ;;  %v452_v49 = vpack.c.bf16 %v449_v47, %v448_v46  ;;  %v980_v8 = vld [vmem:[%s307_s11] ss:$0 sm:$0xff] }
  0xe9   : > { %v460_v31 = vpack.c.bf16 %v1274_v28, %v1271_v27  ;;  %1053 = vmatprep.subr.bf16.mxu1 %v1160_v23  ;;  %1069 = vmatprep.subr.bf16.mxu0 %v1160_v23  ;;  %v621_v36 = vld [vmem:[#allocation2 + $0x9] sm:$0xff]  ;;  %v622_v37 = vld [vmem:[#allocation2 + $0x11] sm:$0xff]  ;;  %v462_v38 = vpack.c.bf16 %v459_v33, %v459_v33  ;;  %v624_v43 = vld [vmem:[#allocation2 + $0x21] sm:$0xff] }
  0xea   : > { %v626_v39 = vpack.c.bf16 %v622_v37, %v621_v36  ;;  %v447_v41 = vld [vmem:[#allocation2 + $0xf] sm:$0xff]  ;;  %v627_v45 = vpack.c.bf16 %v624_v43, %v623_v42  ;;  %v625_v48 = vld [vmem:[#allocation2 + $0x29] sm:$0x3]  ;;  %v450_v51 = vld [vmem:[#allocation2 + $0x27] sm:$0x3] }
  0xeb   : > { %1046 = vmatmul.mubr.msk.bf16.vlgmr.msra.gmra.mxu1 %vm480_vm4, %v461_v29  ;;  %1042 = vmatmul.mubr.msk.bf16.vlgmr.msra.gmra.mxu0 %vm480_vm4, %v460_v31  ;;  %v451_v44 = vpack.c.bf16 %v447_v41, %v446_v40  ;;  %v628_v50 = vpack.c.bf16 %v625_v48, %v625_v48  ;;  %v453_v52 = vpack.c.bf16 %v450_v51, %v450_v51 }
  0xec   : > { %1054 = vmatpush3.bf16.msra.mxu1 %v1128_v30  ;;  %1070 = vmatpush3.bf16.msra.mxu0 %v1129_v32 }
  0xed   : > { %1049 = vmatprep.mubr.msk.bf16.mxu1 %vm1161_vm3, %v1160_v23  ;;  %1055 = vmatprep.subr.bf16.mxu1 %v1160_v23 }
  0xee   : > { %1071 = vmatprep.subr.bf16.mxu0 %v1160_v23  ;;  %1073 = vmatprep.mubr.msk.bf16.mxu0 %vm1161_vm3, %v1160_v23 }
  0xf0   : > { %1056 = vmatpush3.bf16.msra.mxu1 %v1130_v34  ;;  %1072 = vmatpush3.bf16.msra.mxu0 %v1131_v35 }
  0xf3   : > { %1050 = vmatmul.mubr.msk.bf16.gmra.mxu1 %vm480_vm4, %v462_v38  ;;  %1074 = vmatmul.mubr.msk.bf16.vlgmr.msra.gmra.mxu0 %vm480_vm4, %v626_v39 }
  0xf4   : > { %1057 = vmatprep.mubr.msk.bf16.mxu1 %vm1161_vm3, %v1160_v23  ;;  %1077 = vmatprep.mubr.msk.bf16.mxu0 %vm1161_vm3, %v1160_v23 }
  0xfb   : > { %1058 = vmatmul.mubr.msk.bf16.vlgmr.msra.gmra.mxu1 %vm480_vm4, %v451_v44  ;;  %1078 = vmatmul.mubr.msk.bf16.gmra.mxu0 %vm480_vm4, %v627_v45 }
  0xfc   : > { %1061 = vmatprep.mubr.msk.bf16.mxu1 %vm1161_vm3, %v1160_v23  ;;  %1081 = vmatprep.mubr.msk.bf16.mxu0 %vm1161_vm3, %v1160_v23 }
 0x103   : > { %1062 = vmatmul.mubr.msk.bf16.gmra.mxu1 %vm480_vm4, %v452_v49  ;;  %1082 = vmatmul.mubr.msk.bf16.gmra.mxu0 %vm480_vm4, %v628_v50 }
 0x104   : > { %1065 = vmatprep.mubr.msk.bf16.mxu1 %vm1161_vm3, %v1160_v23 }
 0x10b   : > { %1066 = vmatmul.mubr.msk.bf16.gmra.mxu1 %vm480_vm4, %v453_v52 }
 0x1ab   : > { %v532_v53 = vpop.f32.mrf.mxu1  ;;  %v524_v54 = vpop.f32.mrf.mxu0 }
 0x1ad   : > { %v1047_v55 = vpop.f32.mrf.mxu1  ;;  %v1043_v56 = vpop.f32.mrf.mxu0 }
 0x1af   : > { %v534_v57 = vpop.f32.mrf.mxu1  ;;  %v527_v58 = vpop.f32.mrf.mxu0 }
 0x1b1   : > { %v1048_v59 = vpop.f32.mrf.mxu1  ;;  %v1044_v60 = vpop.f32.mrf.mxu0 }
 0x1b3   : > { %v539_v61 = vpop.f32.mrf.mxu1  ;;  %v689_v62 = vpop.f32.mrf.mxu0 }
 0x1b5   : > { %v1051_v63 = vpop.f32.mrf.mxu1  ;;  %v1075_v0 = vpop.f32.mrf.mxu0 }
 0x1b7   : > { %v542_v1 = vpop.f32.mrf.mxu1  ;;  %v692_v2 = vpop.f32.mrf.mxu0 }
 0x1b9   : > { %v1052_v3 = vpop.f32.mrf.mxu1  ;;  %v1076_v4 = vpop.f32.mrf.mxu0 }
 0x1bb   : > { %v600_v5 = vpop.f32.mrf.mxu1  ;;  %v697_v6 = vpop.f32.mrf.mxu0 }
 0x1bc   : > { %v601_v7 = vadd.f32 %v600_v5, %v524_v54  ;;  %v445_v5 = vld [vmem:[#allocation2 + $0x28] sm:$0xff] }
 0x1bd   : > { %v1059_v9 = vpop.f32.mrf.mxu1  ;;  %v1079_v10 = vpop.f32.mrf.mxu0 }
 0x1be   : > { %v710_v11 = vadd.f32 %v689_v62, %v601_v7 }
 0x1bf   : > { %v603_v12 = vpop.f32.mrf.mxu1  ;;  %v699_v13 = vpop.f32.mrf.mxu0 }
 0x1c0   : > { %v721_v14 = vadd.f32 %v980_v8, %v710_v11  ;;  %v604_v15 = vadd.f32 %v603_v12, %v527_v58 }
 0x1c1   : > { %v1060_v16 = vpop.f32.mrf.mxu1  ;;  %v1080_v17 = vpop.f32.mrf.mxu0 }
 0x1c2   : > { %v981_v18 = vmul.f32 -1.442695, %v721_v14  ;;  %v711_v19 = vadd.f32 %v692_v2, %v604_v15 }
 0x1c3   : > { %v608_v20 = vpop.f32.mrf.mxu1  ;;  %v704_v21 = vpop.f32.mrf.mxu0 }
 0x1c4   : > { %1132 = vpow2.f32 %v981_v18  ;;  %v722_v22 = vadd.f32 %v980_v8, %v711_v19 }
 0x1c5   : > { %v1063_v23 = vpop.f32.mrf.mxu1  ;;  %v1083_v24 = vpop.f32.mrf.mxu0 }
 0x1c6   : > { %v982_v26 = vmul.f32 -1.442695, %v722_v22 }
 0x1c7   : > { %v610_v29 = vpop.f32.mrf.mxu1  ;;  %v707_v30 = vpop.f32.mrf.mxu0 }
 0x1c8   : > { %1134 = vpow2.f32 %v982_v26  ;;  %v611_v31 = vadd.f32 %v610_v29, %v534_v57 }
 0x1c9   : > { %v1064_v32 = vpop.f32.mrf.mxu1  ;;  %v1084_v33 = vpop.f32.mrf.mxu0 }
 0x1ca   : > { %v712_v34 = vadd.f32 %v699_v13, %v611_v31 }
 0x1cb   : > { %v615_v35 = vpop.f32.mrf.mxu1 }
 0x1cc   : > { %v723_v36 = vadd.f32 %v980_v8, %v712_v34  ;;  %v616_v37 = vadd.f32 %v615_v35, %v539_v61 }
 0x1cd   : > { %v1067_v38 = vpop.f32.mrf.mxu1 }
 0x1ce   : > { %v983_v39 = vmul.f32 -1.442695, %v723_v36  ;;  %v713_v40 = vadd.f32 %v704_v21, %v616_v37 }
 0x1cf   : > { %v618_v41 = vpop.f32.mrf.mxu1 }
 0x1d0   : > { %1136 = vpow2.f32 %v983_v39  ;;  %v724_v42 = vadd.f32 %v980_v8, %v713_v40 }
 0x1d1   : > { %v1133_v43 = vpop.eup %1132  ;;  %v1068_v44 = vpop.f32.mrf.mxu1 }
 0x1d2   : > { %v737_v45 = vadd.f32 1.0, %v1133_v43  ;;  %v984_v46 = vmul.f32 -1.442695, %v724_v42 }
 0x1d4   : > { %1138 = vrcp.f32 %v737_v45 }
 0x1d5   : > { %v1135_v47 = vpop.eup %1134  ;;  %1140 = vpow2.f32 %v984_v46 }
 0x1d6   : > { %v738_v48 = vadd.f32 1.0, %v1135_v47 }
 0x1d8   : > { %1142 = vrcp.f32 %v738_v48 }
 0x1dd   : > { %v1137_v49 = vpop.eup %1136 }
 0x1de   : > { %v739_v50 = vadd.f32 1.0, %v1137_v49 }
 0x1e0   : > { %1144 = vrcp.f32 %v739_v50 }
 0x1e1   : > { %v1139_v51 = vpop.eup %1138 }
 0x1e2   : > { %v1141_v52 = vpop.eup %1140  ;;  %753 = vrot.lane.b32.xlu0 %v1139_v51, %s1162_s30 }
 0x1e3   : > { %v740_v53 = vadd.f32 1.0, %v1141_v52 }
 0x1e5   : > { %v1143_v54 = vpop.eup %1142  ;;  %1146 = vrcp.f32 %v740_v53 }
 0x1e6   : > { %755 = vrot.lane.b32.xlu0 %v1143_v54, %s1162_s30 }
 0x1ed   : > { %v1145_v55 = vpop.eup %1144 }
 0x1ee   : > { %757 = vrot.lane.b32.xlu1 %v1145_v55, %s1162_s30 }
 0x1f2   : > { %v1147_v56 = vpop.eup %1146 }
 0x1f3   : > { %759 = vrot.lane.b32.xlu1 %v1147_v56, %s1162_s30 }
 0x254   : > { %v754_v57 = vpop.permute.xlu0 %753 }
 0x255   : > { %v765_v58 = vmul.f32 %v754_v57, %v721_v14 }
 0x257   : > { %v769_v59 = vadd.f32 %v765_v58, %v1271_v27 }
 0x258   : > { %v756_v60 = vpop.permute.xlu0 %755 }
 0x259   : > { %v771_v61 = vmul.f32 0.70710677, %v769_v59  ;;  %v766_v62 = vmul.f32 %v756_v60, %v722_v22 }
 0x25b   : > { %773 = vst.msk [vmem:[#allocation2 + $0x8] sm:$0xff] %vm480_vm4, %v771_v61  ;;  %v770_v63 = vadd.f32 %v766_v62, %v1274_v28 }
 0x25d   : > { %v772_v0 = vmul.f32 0.70710677, %v770_v63 }
 0x25f   : > { %775 = vst.msk [vmem:[#allocation2 + $0x10] sm:$0x3] %vm774_vm5, %v772_v0 }
 0x260   : > { %v758_v1 = vpop.permute.xlu1 %757 }
 0x261   : > { %v767_v2 = vmul.f32 %v758_v1, %v723_v36 }
 0x263   : > { %v776_v3 = vadd.f32 %v767_v2, %v1268_v25 }
 0x265   : > { %v778_v4 = vmul.f32 0.70710677, %v776_v3  ;;  %v760_v6 = vpop.permute.xlu1 %759 }
 0x266   : > { %v768_v7 = vmul.f32 %v760_v6, %v724_v42 }
 0x267   : > { %780 = vst.msk [vmem:[#allocation2 + $0x20] sm:$0xff] %vm480_vm4, %v778_v4 }
 0x268   : > { %v777_v27 = vadd.f32 %v768_v7, %v445_v5  ;;  %785 = sbr.rel (%p985_p6) target bundleno = 842 (0x34a), region = 56 }
 0x26a   : > { %v779_v8 = vmul.f32 0.70710677, %v777_v27 }
 0x26c   : > { %781 = vst.msk [vmem:[#allocation2 + $0x28] sm:$0x3] %vm774_vm5, %v779_v8 }
 0x26d   : > { %v1148_v28 = vld [vmem:[%s1376_s5 + $0x8] sm:$0xff]   ;;  %v1163_v9 = vmov 0.0   ;;  %v1149_v25 = vld [vmem:[%s1376_s5] sm:$0xff]   ;;  %v788_v10 = vld [vmem:[#allocation2 + $0x10] sm:$0xff]  ;;  %vm1164_vm6 = vmmov 0  }
 0x26e   : > { %1105 = vmatprep.subr.bf16.mxu1 %v1163_v9  ;;  %1085 = vmatprep.subr.bf16.mxu0 %v1163_v9  ;;  %v789_v11 = vld [vmem:[#allocation2 + $0x18] sm:$0xff]  ;;  %v786_v12 = vld [vmem:[#allocation2] sm:$0xff]  ;;  %v787_v13 = vld [vmem:[#allocation2 + $0x8] sm:$0xff] }
 0x26f   : > { %1107 = vmatpush3.bf16.msra.mxu1 %v1148_v28  ;;  %1086 = vmatpush3.bf16.msra.mxu0 %v1148_v28  ;;  %v793_v14 = vpack.c.bf16 %v789_v11, %v788_v10  ;;  %v792_v15 = vpack.c.bf16 %v787_v13, %v786_v12  ;;  %v790_v16 = vld [vmem:[#allocation2 + $0x20] sm:$0xff]  ;;  %v883_v21 = vld [vmem:[%s1371_s0 + $0x8] sm:$0x3]  ;;  %v892_v39 = vld [vmem:[%s1371_s0 + $0xa] sm:$0xff] }
 0x270   : > { %1106 = vmatprep.subr.bf16.mxu1 %v1163_v9  ;;  %1087 = vmatprep.subr.bf16.mxu0 %v1163_v9  ;;  %v986_v19 = vld [vmem:[%s1377_s6] ss:$0 sm:$0xff]  ;;  %v893_v45 = vld [vmem:[%s1371_s0 + $0x12] sm:$0x3] }
 0x271   : > { %1093 = vmatprep.mubr.msk.bf16.mxu1 %vm1164_vm6, %v1163_v9  ;;  %1089 = vmatprep.mubr.msk.bf16.mxu0 %vm1164_vm6, %v1163_v9  ;;  %v882_v32 = vld [vmem:[%s1371_s0] sm:$0xff] }
 0x273   : > { %1108 = vmatpush3.bf16.msra.mxu1 %v1149_v25  ;;  %1088 = vmatpush3.bf16.msra.mxu0 %v1149_v25  ;;  %v791_v17 = vld [vmem:[#allocation2 + $0x28] sm:$0xff] }
 0x274   : > { %v794_v18 = vpack.c.bf16 %v791_v17, %v790_v16 }
 0x276   : > { %1094 = vmatmul.mubr.msk.bf16.vlgmr.msra.gmra.mxu1 %vm480_vm4, %v793_v14  ;;  %1090 = vmatmul.mubr.msk.bf16.vlgmr.msra.gmra.mxu0 %vm480_vm4, %v792_v15 }
 0x277   : > { %1097 = vmatprep.mubr.msk.bf16.mxu1 %vm1164_vm6, %v1163_v9 }
 0x27e   : > { %1098 = vmatmul.mubr.msk.bf16.gmra.mxu1 %vm480_vm4, %v794_v18 }
 0x336   : > { %v868_v20 = vpop.f32.mrf.mxu1  ;;  %v861_v22 = vpop.f32.mrf.mxu0 }
 0x337   : > { %v869_v23 = vadd.f32 %v986_v19, %v868_v20 }
 0x338   : > { %v1095_v24 = vpop.f32.mrf.mxu1  ;;  %v1091_v26 = vpop.f32.mrf.mxu0 }
 0x339   : > { %885 = vst.msk [vmem:[%s1378_s7 + $0x8] sm:$0x3] %vm774_vm5, %v869_v23  ;;  %v887_v29 = vadd.f32 %v883_v21, %v869_v23 }
 0x33a   : > { %v871_v30 = vpop.f32.mrf.mxu1  ;;  %v863_v31 = vpop.f32.mrf.mxu0 }
 0x33b   : > { %v889_v33 = vmul.f32 0.70710677, %v887_v29  ;;  %v864_v34 = vadd.f32 %v986_v19, %v863_v31 }
 0x33c   : > { %v1096_v35 = vpop.f32.mrf.mxu1  ;;  %v1092_v36 = vpop.f32.mrf.mxu0 }
 0x33d   : > { %891 = vst.msk [vmem:[%s1379_s8 + $0x8] sm:$0x3] %vm774_vm5, %v889_v33  ;;  %v886_v37 = vadd.f32 %v882_v32, %v864_v34 }
 0x33e   : > { %884 = vst.msk [vmem:[%s1378_s7] sm:$0xff] %vm480_vm4, %v864_v34  ;;  %v875_v38 = vpop.f32.mrf.mxu1 }
 0x33f   : > { %v888_v40 = vmul.f32 0.70710677, %v886_v37  ;;  %v876_v41 = vadd.f32 %v986_v19, %v875_v38 }
 0x340   : > { %v1099_v42 = vpop.f32.mrf.mxu1 }
 0x341   : > { %890 = vst.msk [vmem:[%s1379_s8] sm:$0xff] %vm480_vm4, %v888_v40  ;;  %894 = vst.msk [vmem:[%s1378_s7 + $0xa] sm:$0xff] %vm480_vm4, %v876_v41  ;;  %v896_v43 = vadd.f32 %v892_v39, %v876_v41 }
 0x342   : > { %v878_v44 = vpop.f32.mrf.mxu1 }
 0x343   : > { %v898_v46 = vmul.f32 0.70710677, %v896_v43  ;;  %v879_v47 = vadd.f32 %v986_v19, %v878_v44 }
 0x344   : > { %v1100_v48 = vpop.f32.mrf.mxu1 }
 0x345   : > { %900 = vst.msk [vmem:[%s1379_s8 + $0xa] sm:$0xff] %vm480_vm4, %v898_v46  ;;  %v897_v49 = vadd.f32 %v893_v45, %v879_v47 }
 0x346   : > { %895 = vst.msk [vmem:[%s1378_s7 + $0x12] sm:$0x3] %vm774_vm5, %v879_v47 }
 0x347   : > { %v899_v50 = vmul.f32 0.70710677, %v897_v49 }
 0x349   : > { %901 = vst.msk [vmem:[%s1379_s8 + $0x12] sm:$0x3] %vm774_vm5, %v899_v50 }
 0x34a PF: > { %s19_s27 = sadd.s32 1, %s1156_s27  }
 0x34b   : > { %p16_p7 = scmp.ge.s32.totalorder %s19_s27, 4  }
 0x34d   :  { %18 = sbr.rel (!%p16_p7) target bundleno = 1 (0x1), region = 95 }

// kernel: fwd.4
= control target key start
LH: loop header
LB: loop body
LE: loop exit
PB: predicated region body
PF: predicated region fallthrough
CT: control target
= control target key end

     0   :  { %s1777_s25 = smov 0   ;;  %s1963_s0 = inlined_call_operand.vmem [shape: f32[16,32], index: 0, kind: input, shape index: {}]   ;;  %s1964_s1 = inlined_call_operand.vmem [shape: bf16[2,32,10], index: 1, kind: input, shape index: {}]   ;;  %s1965_s2 = inlined_call_operand.vmem [shape: bf16[2,10,32], index: 2, kind: input, shape index: {}]   ;;  %s1966_s3 = inlined_call_operand.vmem [shape: bf16[32,32], index: 3, kind: input, shape index: {}]   ;;  %s1967_s4 = inlined_call_operand.vmem [shape: f32[1,32], index: 4, kind: input, shape index: {}]   ;;  %s1968_s5 = inlined_call_operand.vmem [shape: bf16[6,32,64], index: 5, kind: input, shape index: {}]   ;;  %s1969_s6 = inlined_call_operand.vmem [shape: f32[2,1,64], index: 6, kind: input, shape index: {}]   ;;  %s1970_s7 = inlined_call_operand.vmem [shape: bf16[32,32], index: 7, kind: input, shape index: {}]   ;;  %s1971_s8 = inlined_call_operand.vmem [shape: f32[1,32], index: 8, kind: input, shape index: {}]   ;;  %s1972_s9 = inlined_call_operand.vmem [shape: bf16[32,32], index: 9, kind: input, shape index: {}]   ;;  %s1973_s10 = inlined_call_operand.vmem [shape: f32[1,32], index: 10, kind: input, shape index: {}]   ;;  %s1974_s11 = inlined_call_operand.vmem [shape: bf16[32,32], index: 11, kind: input, shape index: {}]   ;;  %s1975_s12 = inlined_call_operand.vmem [shape: f32[1,32], index: 12, kind: input, shape index: {}]   ;;  %s1976_s13 = inlined_call_operand.vmem [shape: f32[16,32], index: 13, kind: output, shape index: {}]  }
   0x1 LB: > { %s1783_s26 = sadd.s32 4294967295, %s1700_s25   ;;  %p1431_p0 = scmp.ge.s32.totalorder %s1700_s25, 1  ;;  %s1700_s25 = sphi %s1777_s25, %s23_s25  }
   0x2   : > { %p392_p1 = scmp.lt.s32.totalorder %s1700_s25, 3 }
   0x4   : > { %p393_p2 = pnand %p1431_p0, %p392_p1 }
   0x5   : > { %s435_s27 = smul.u32 (!%p393_p2), 3, %s1783_s26  ;;  %p442_p3 = scmp.lt.s32.totalorder (!%p393_p2), %s1783_s26, 1 }
   0x6   : > { %396 = sbr.rel (%p393_p2) target bundleno = 2432 (0x980), region = 72  ;;  %p1434_p5 = scmp.ne.s32.totalorder (!%p393_p2), %s1783_s26, 0 }
   0x7   : > { %p436_p4 = scmp.lt.s32.totalorder (!%p393_p2), %s435_s27, 5 }
   0xb   : > { %s1790_s28 = scalar_select %p442_p3, %s1783_s26, 1 }
   0xc   : > { %s1978_s27 = smov (!%p436_p4, %s435_s27), 5  ;;  %449 = sbr.rel (%p1434_p5) target bundleno = 225 (0xe1), region = 76 }
   0xd   : > { %s444_s14 = scalar_lea.vmem %s1969_s6, %s1790_s28  ;;  %s1498_s15 = sshll.u32 %s1978_s27, 4 }
   0xe   : > { %s1799_s18 = scalar_lea.vmem %s1968_s5, %s1498_s15 }
  0x11   : > { %v1654_v0 = vld [vmem:[%s1966_s3 + $0x8] sm:$0xff]   ;;  %v1702_v1 = vmov 0.0   ;;  %v1655_v2 = vld [vmem:[%s1966_s3] sm:$0xff]   ;;  %vm450_vm0 = vcmask 261120   ;;  %vm1703_vm1 = vmmov 0  }
  0x12   : > { %1541 = vmatprep.subr.bf16.mxu0 %v1702_v1  ;;  %1549 = vmatprep.subr.bf16.mxu1 %v1702_v1  ;;  %v460_v3 = vld [vmem:[%s1963_s0] sm:$0xff]  ;;  %v524_v4 = vld [vmem:[%s1963_s0 + $0x8] sm:$0xff]  ;;  %451 = vst.msk [vmem:[#allocation2] sm:$0xff] %vm450_vm0, %v1702_v1  ;;  %453 = vst.msk [vmem:[#allocation2 + $0x10] sm:$0xff] %vm450_vm0, %v1702_v1 }
  0x13   : > { %1542 = vmatpush3.bf16.msra.mxu0 %v1654_v0  ;;  %1550 = vmatpush3.bf16.msra.mxu1 %v1654_v0  ;;  %452 = vst.msk [vmem:[#allocation2 + $0x8] sm:$0xff] %vm450_vm0, %v1702_v1  ;;  %454 = vst.msk [vmem:[#allocation2 + $0x18] sm:$0xff] %vm450_vm0, %v1702_v1  ;;  %v461_v5 = vpack.c.bf16 %v460_v3, %v460_v3  ;;  %v525_v6 = vpack.c.bf16 %v524_v4, %v524_v4  ;;  %v1435_v7 = vld [vmem:[%s1967_s4] ss:$0 sm:$0xff] }
  0x14   : > { %1543 = vmatprep.subr.bf16.mxu0 %v1702_v1  ;;  %1551 = vmatprep.subr.bf16.mxu1 %v1702_v1 }
  0x15   : > { %1545 = vmatprep.mubr.msk.bf16.mxu0 %vm1703_vm1, %v1702_v1  ;;  %1553 = vmatprep.mubr.msk.bf16.mxu1 %vm1703_vm1, %v1702_v1 }
  0x17   : > { %1544 = vmatpush3.bf16.msra.mxu0 %v1655_v2  ;;  %1552 = vmatpush3.bf16.msra.mxu1 %v1655_v2 }
  0x1a   : > { %1546 = vmatmul.mubr.msk.bf16.vlgmr.msra.gmra.mxu0 %vm450_vm0, %v461_v5  ;;  %1554 = vmatmul.mubr.msk.bf16.vlgmr.msra.gmra.mxu1 %vm450_vm0, %v525_v6 }
  0xda   : > { %v517_v8 = vpop.f32.mrf.mxu0  ;;  %v563_v9 = vpop.f32.mrf.mxu1 }
  0xdb   : > { %v518_v10 = vadd.f32 %v1435_v7, %v517_v8  ;;  %v564_v11 = vadd.f32 %v1435_v7, %v563_v9 }
  0xdc   : > { %v1547_v12 = vpop.f32.mrf.mxu0  ;;  %v1555_v13 = vpop.f32.mrf.mxu1 }
  0xdd   : > { %523 = vst.msk [vmem:[#allocation2 + $0x8] sm:$0xff] %vm450_vm0, %v518_v10  ;;  %569 = vst.msk [vmem:[#allocation2 + $0x18] sm:$0xff] %vm450_vm0, %v564_v11 }
  0xde   : > { %v520_v14 = vpop.f32.mrf.mxu0  ;;  %v566_v15 = vpop.f32.mrf.mxu1 }
  0xe0   : > { %v1548_v16 = vpop.f32.mrf.mxu0  ;;  %v1556_v17 = vpop.f32.mrf.mxu1 }
  0xe1 PF: > { %v1656_v18 = vld [vmem:[%s1799_s18 + $0x18] sm:$0xff]   ;;  %v1657_v19 = vld [vmem:[%s1799_s18 + $0x8] sm:$0xff]   ;;  %v1658_v20 = vld [vmem:[%s1799_s18 + $0x10] sm:$0xff]   ;;  %vm603_vm2 = vcmask 261120   ;;  %s1704_s20 = smov 96   ;;  %vm1706_vm3 = vmmov 0  }
  0xe2   : > { %1557 = vmatprep.subr.bf16.mxu0 %v1656_v18  ;;  %1565 = vmatprep.subr.bf16.mxu1 %v1657_v19  ;;  %v1659_v21 = vld [vmem:[%s1799_s18] sm:$0xff]   ;;  %v1660_v31 = vld [vmem:[%s1799_s18 + $0x28] sm:$0xff]   ;;  %v724_v35 = vld [vmem:[#allocation2 + $0x10] sm:$0xff]  ;;  %vm990_vm4 = vcmask 80896   ;;  %vm1013_vm5 = vcmask 1044480   ;;  %p1490_p6 = scmp.ne.s32.totalorder %s1783_s26, 1 }
  0xe3   : > { %1558 = vmatpush3.bf16.msra.mxu0 %v1656_v18  ;;  %1566 = vmatpush3.bf16.msra.mxu1 %v1657_v19  ;;  %v1661_v33 = vld [vmem:[%s1799_s18 + $0x20] sm:$0xff]   ;;  %v1662_v5 = vld [vmem:[%s1970_s7 + $0x8] sm:$0xff]  }
  0xe4   : > { %1559 = vmatprep.subr.bf16.mxu0 %v1658_v20  ;;  %v581_v22 = vld [vmem:[#allocation2 + $0x7] sm:$0xff]  ;;  %v582_v23 = vld [vmem:[#allocation2 + $0xf] sm:$0xff]  ;;  %1567 = vmatprep.subr.bf16.mxu1 %v1659_v21  ;;  %v583_v27 = vld [vmem:[#allocation2 + $0x17] sm:$0xff] }
  0xe5   : > { %v572_v24 = vld [vmem:[#allocation2 + $0x6] sm:$0xff]  ;;  %v584_v25 = vpack.c.bf16 %v582_v23, %v581_v22  ;;  %v573_v26 = vld [vmem:[#allocation2 + $0xe] sm:$0xff]  ;;  %v574_v28 = vld [vmem:[#allocation2 + $0x16] sm:$0xff]  ;;  %v585_v30 = vpack.c.bf16 %v583_v27, %v583_v27 }
  0xe6   : > { %v575_v29 = vpack.c.bf16 %v573_v26, %v572_v24  ;;  %v576_v32 = vpack.c.bf16 %v574_v28, %v574_v28  ;;  %v1833_v34 = vld [vmem:[#allocation2 + $0x8] sm:$0xff]  ;;  %v1836_v37 = vld [vmem:[#allocation2 + $0x18] sm:$0xff]  ;;  %v1460_v48 = vld [vmem:[%s444_s14] ss:$0 sm:$0xff] }
  0xe7   : > { %1560 = vmatpush3.bf16.msra.mxu0 %v1658_v20  ;;  %1561 = vmatprep.mubr.msk.bf16.mxu0 %vm603_vm2, %v584_v25  ;;  %v725_v36 = vpack.c.bf16 %v724_v35, %v1833_v34  ;;  %v726_v38 = vpack.c.bf16 %v1836_v37, %v1836_v37  ;;  %v1663_v7 = vld [vmem:[%s1970_s7] sm:$0xff]   ;;  %v1664_v19 = vld [vmem:[%s1964_s1 + $0x8] sm:$0xff]   ;;  %v1705_v20 = vmov 0.0  }
  0xe8   : > { %1568 = vmatpush3.bf16.msra.mxu1 %v1659_v21  ;;  %1569 = vmatprep.mubr.msk.bf16.mxu1 %vm603_vm2, %v575_v29  ;;  %v1665_v21 = vld [vmem:[%s1964_s1] sm:$0xff]  }
  0xe9   : > { %1573 = vmatprep.subr.bf16.mxu0 %v1660_v31  ;;  %1581 = vmatprep.subr.bf16.mxu1 %v1662_v5  ;;  %v1464_v22 = vld [vmem:[%s1971_s8] ss:$0 sm:$0xff] }
  0xea   : > { %1562 = vmatmul.mubr.msk.bf16.vlgmr.msra.gmra.mxu0 %vm603_vm2, %v585_v30  ;;  %v927_v26 = vld [vmem:[%s1963_s0] sm:$0xff] }
  0xeb   : > { %1570 = vmatmul.mubr.msk.bf16.vlgmr.msra.gmra.mxu1 %vm603_vm2, %v576_v32  ;;  %1574 = vmatpush3.bf16.msra.mxu0 %v1660_v31 }
  0xec   : > { %1575 = vmatprep.subr.bf16.mxu0 %v1661_v33  ;;  %1577 = vmatprep.mubr.msk.bf16.mxu0 %vm603_vm2, %v725_v36 }
  0xed   : > { %1582 = vmatpush3.bf16.msra.mxu1 %v1662_v5 }
  0xee   : > { %1583 = vmatprep.subr.bf16.mxu1 %v1663_v7 }
  0xef   : > { %1576 = vmatpush3.bf16.msra.mxu0 %v1661_v33 }
  0xf0   : > { %1589 = vmatprep.subr.bf16.mxu0 %v1705_v20 }
  0xf1   : > { %1584 = vmatpush3.bf16.msra.mxu1 %v1663_v7 }
  0xf2   : > { %1578 = vmatmul.mubr.msk.bf16.vlgmr.msra.gmra.mxu0 %vm603_vm2, %v726_v38  ;;  %1597 = vmatprep.subr.bf16.mxu1 %v1705_v20 }
  0xf3   : > { %1590 = vmatpush3.bf16.msra.mxu0 %v1664_v19  ;;  %1593 = vmatprep.mubr.msk.bf16.mxu0 %vm1706_vm3, %v1705_v20 }
  0xf4   : > { %1591 = vmatprep.subr.bf16.mxu0 %v1705_v20 }
  0xf7   : > { %1592 = vmatpush3.bf16.msra.mxu0 %v1665_v21 }
  0xf8   : > { %1603 = vmatprep.subr.bf16.mxu0 %v1705_v20 }
 0x1aa   : > { %v1563_v39 = vpop.f32.mrf.mxu0 }
 0x1ab   : > { %v1571_v40 = vpop.f32.mrf.mxu1 }
 0x1ac   : > { %v644_v41 = vpop.f32.mrf.mxu0  ;;  %v719_v46 = vadd.f32 %v1571_v40, %v1563_v39 }
 0x1ad   : > { %v710_v42 = vpop.f32.mrf.mxu1 }
 0x1ae   : > { %v1564_v43 = vpop.f32.mrf.mxu0  ;;  %v711_v49 = vadd.f32 %v710_v42, %v644_v41 }
 0x1af   : > { %v1572_v44 = vpop.f32.mrf.mxu1 }
 0x1b0   : > { %v647_v45 = vpop.f32.mrf.mxu0 }
 0x1b1   : > { %v713_v51 = vpop.f32.mrf.mxu1 }
 0x1b2   : > { %v1579_v47 = vpop.f32.mrf.mxu0  ;;  %v714_v56 = vadd.f32 %v713_v51, %v647_v45  ;;  %v1666_v45 = vld [vmem:[%s1965_s2] sm:$0x1f]  }
 0x1b3   : > { %v800_v50 = vadd.f32 %v1579_v47, %v719_v46  ;;  %v1015_v46 = vsel %vm1013_vm5, %v1666_v45, 0  ;;  %v1669_v47 = vld [vmem:[%s1972_s9 + $0x8] sm:$0xff]  }
 0x1b4   : > { %v784_v52 = vpop.f32.mrf.mxu0 }
 0x1b5   : > { %v810_v53 = vadd.f32 %v1460_v48, %v800_v50  ;;  %v798_v54 = vadd.f32 %v784_v52, %v711_v49  ;;  %v1124_v50 = vld [vmem:[%s1963_s0 + $0x8] sm:$0xff]  ;;  %v1667_v52 = vld [vmem:[%s1964_s1 + $0x18] sm:$0xff]  }
 0x1b6   : > { %v1580_v55 = vpop.f32.mrf.mxu0 }
 0x1b7   : > { %v1463_v57 = vmul.f32 -1.442695, %v810_v53  ;;  %v808_v58 = vadd.f32 %v1460_v48, %v798_v54  ;;  %v1668_v55 = vld [vmem:[%s1964_s1 + $0x10] sm:$0xff]  }
 0x1b8   : > { %v787_v59 = vpop.f32.mrf.mxu0 }
 0x1b9   : > { %1672 = vpow2.f32 %v1463_v57  ;;  %v1461_v60 = vmul.f32 -1.442695, %v808_v58  ;;  %v799_v61 = vadd.f32 %v787_v59, %v714_v56 }
 0x1bb   : > { %1674 = vpow2.f32 %v1461_v60  ;;  %v809_v62 = vadd.f32 %v1460_v48, %v799_v61 }
 0x1bd   : > { %v1462_v63 = vmul.f32 -1.442695, %v809_v62 }
 0x1bf   : > { %1676 = vpow2.f32 %v1462_v63 }
 0x1c6   : > { %v1673_v0 = vpop.eup %1672 }
 0x1c7   : > { %v822_v1 = vadd.f32 1.0, %v1673_v0 }
 0x1c8   : > { %v1675_v2 = vpop.eup %1674 }
 0x1c9   : > { %1678 = vrcp.f32 %v822_v1  ;;  %v820_v3 = vadd.f32 1.0, %v1675_v2 }
 0x1cb   : > { %1680 = vrcp.f32 %v820_v3 }
 0x1cc   : > { %v1677_v4 = vpop.eup %1676 }
 0x1cd   : > { %v821_v6 = vadd.f32 1.0, %v1677_v4 }
 0x1cf   : > { %1682 = vrcp.f32 %v821_v6 }
 0x1d6   : > { %v1679_v8 = vpop.eup %1678 }
 0x1d7   : > { %836 = vrot.lane.b32.xlu1 %v1679_v8, %s1704_s20 }
 0x1d8   : > { %v1681_v9 = vpop.eup %1680 }
 0x1d9   : > { %832 = vrot.lane.b32.xlu0 %v1681_v9, %s1704_s20 }
 0x1dc   : > { %v1683_v10 = vpop.eup %1682 }
 0x1dd   : > { %834 = vrot.lane.b32.xlu0 %v1683_v10, %s1704_s20  ;;  %v1671_v10 = vld [vmem:[%s1965_s2 + $0x8] sm:$0x1f]  }
 0x249   : > { %v837_v12 = vpop.permute.xlu1 %836 }
 0x24a   : > { %v1855_v13 = vmul.f32 %v837_v12, %v810_v53  ;;  %v1474_v12 = vld [vmem:[%s1973_s10] ss:$0 sm:$0xff] }
 0x24b   : > { %v833_v11 = vpop.permute.xlu0 %832 }
 0x24c   : > { %v1857_v15 = vmul.f32 %v833_v11, %v808_v58  ;;  %v845_v18 = vpack.c.bf16 %v1855_v13, %v1855_v13  ;;  %v1670_v58 = vld [vmem:[%s1972_s9] sm:$0xff]   ;;  %v1212_v11 = vsel %vm1013_vm5, %v1671_v10, 0 }
 0x24f   : > { %v835_v14 = vpop.permute.xlu0 %834 }
 0x250   : > { %v842_v16 = vmul.f32 %v835_v14, %v809_v62 }
 0x252   : > { %v844_v17 = vpack.c.bf16 %v842_v16, %v1857_v15 }
 0x254   : > { %1585 = vmatprep.mubr.msk.bf16.mxu1 %vm603_vm2, %v844_v17 }
 0x255   : > { %1586 = vmatmul.mubr.msk.bf16.vlgmr.msra.gmra.mxu1 %vm603_vm2, %v845_v18 }
 0x256   : > { %1599 = vmatprep.mubr.msk.bf16.mxu1 %vm1706_vm3, %v1705_v20  ;;  %1598 = vmatpush3.bf16.msra.mxu1 %v1015_v46 }
 0x257   : > { %1611 = vmatprep.subr.bf16.mxu1 %v1705_v20 }
 0x315   : > { %v1587_v23 = vpop.f32.mrf.mxu1 }
 0x316   : > { %v917_v24 = vadd.f32 %v1587_v23, %v1464_v22 }
 0x317   : > { %v909_v25 = vpop.f32.mrf.mxu1 }
 0x318   : > { %v910_v27 = vadd.f32 %v1464_v22, %v909_v25  ;;  %v1125_v53 = vadd.f32 %v1124_v50, %v917_v24 }
 0x319   : > { %v1588_v28 = vpop.f32.mrf.mxu1 }
 0x31a   : > { %v928_v29 = vadd.f32 %v927_v26, %v910_v27  ;;  %v1126_v56 = vmul.f32 0.70710677, %v1125_v53 }
 0x31b   : > { %v912_v30 = vpop.f32.mrf.mxu1 }
 0x31c   : > { %v929_v31 = vmul.f32 0.70710677, %v928_v29  ;;  %v1127_v57 = vpack.c.bf16 %v1126_v56, %v1126_v56 }
 0x31e   : > { %v930_v32 = vpack.c.bf16 %v929_v31, %v929_v31 }
 0x320   : > { %1594 = vmatmul.mubr.msk.bf16.vlgmr.msra.gmra.mxu0 %vm603_vm2, %v930_v32 }
 0x321   : > { %1607 = vmatprep.mubr.msk.bf16.mxu0 %vm1706_vm3, %v1705_v20  ;;  %1604 = vmatpush3.bf16.msra.mxu0 %v1669_v47 }
 0x322   : > { %1605 = vmatprep.subr.bf16.mxu0 %v1705_v20 }
 0x325   : > { %1606 = vmatpush3.bf16.msra.mxu0 %v1670_v58 }
 0x326   : > { %1619 = vmatprep.subr.bf16.mxu0 %v1705_v20 }
 0x3e0   : > { %v984_v33 = vpop.f32.mrf.mxu0 }
 0x3e1   : > { %v991_v35 = vsel %vm990_vm4, %v984_v33, -inf }
 0x3e2   : > { %992 = vmax.xlane.f32.xlu1 %v991_v35  ;;  %v1595_v36 = vpop.f32.mrf.mxu0 }
 0x3e4   : > { %v987_v38 = vpop.f32.mrf.mxu0 }
 0x3e6   : > { %v1596_v39 = vpop.f32.mrf.mxu0 }
 0x46b   : > { %v993_v40 = vpop.xlane.xlu1 %992 }
 0x46c   : > { %v994_v41 = vsub.f32 %v984_v33, %v993_v40 }
 0x46e   : > { %v995_v42 = vmul.f32 1.442695, %v994_v41 }
 0x470   : > { %1684 = vpow2.f32 %v995_v42 }
 0x47d   : > { %v1685_v43 = vpop.eup %1684 }
 0x47e   : > { %v997_v44 = vsel %vm990_vm4, %v1685_v43, 0.0 }
 0x47f   : > { %998 = vadd.xlane.f32.xlu0 %v997_v44 }
 0x508   : > { %v999_v48 = vpop.xlane.xlu0 %998 }
 0x509   : > { %1686 = vrcp.f32 %v999_v48 }
 0x516   : > { %v1687_v49 = vpop.eup %1686 }
 0x517   : > { %v1001_v51 = vmul.f32 %v1687_v49, %v1685_v43 }
 0x519   : > { %v1002_v54 = vpack.c.bf16 %v1001_v51, %v1001_v51 }
 0x51b   : > { %1600 = vmatmul.mubr.msk.bf16.vlgmr.msra.gmra.mxu1 %vm990_vm4, %v1002_v54 }
 0x51c   : > { %1612 = vmatpush3.bf16.msra.mxu1 %v1667_v52  ;;  %1615 = vmatprep.mubr.msk.bf16.mxu1 %vm1706_vm3, %v1705_v20 }
 0x51d   : > { %1613 = vmatprep.subr.bf16.mxu1 %v1705_v20 }
 0x520   : > { %1614 = vmatpush3.bf16.msra.mxu1 %v1668_v55 }
 0x521   : > { %1625 = vmatprep.subr.bf16.mxu1 %v1705_v20 }
 0x523   : > { %1616 = vmatmul.mubr.msk.bf16.vlgmr.msra.gmra.mxu1 %vm603_vm2, %v1127_v57 }
 0x524   : > { %1626 = vmatpush3.bf16.msra.mxu1 %v1669_v47  ;;  %1629 = vmatprep.mubr.msk.bf16.mxu1 %vm1706_vm3, %v1705_v20 }
 0x525   : > { %1627 = vmatprep.subr.bf16.mxu1 %v1705_v20 }
 0x528   : > { %1628 = vmatpush3.bf16.msra.mxu1 %v1670_v58 }
 0x5db   : > { %v1051_v59 = vpop.f32.mrf.mxu1 }
 0x5dc   : > { %v1057_v60 = vpack.c.bf16 %v1051_v59, %v1051_v59 }
 0x5dd   : > { %v1601_v61 = vpop.f32.mrf.mxu1 }
 0x5de   : > { %1608 = vmatmul.mubr.msk.bf16.vlgmr.msra.gmra.mxu0 %vm603_vm2, %v1057_v60 }
 0x5df   : > { %v1054_v62 = vpop.f32.mrf.mxu1  ;;  %1621 = vmatprep.mubr.msk.bf16.mxu0 %vm1706_vm3, %v1705_v20  ;;  %1620 = vmatpush3.bf16.msra.mxu0 %v1212_v11 }
 0x5e1   : > { %v1602_v63 = vpop.f32.mrf.mxu1 }
 0x5e3   : > { %v1182_v0 = vpop.f32.mrf.mxu1 }
 0x5e4   : > { %v1188_v1 = vsel %vm990_vm4, %v1182_v0, -inf }
 0x5e5   : > { %1189 = vmax.xlane.f32.xlu0 %v1188_v1  ;;  %v1617_v2 = vpop.f32.mrf.mxu1 }
 0x5e7   : > { %v1185_v3 = vpop.f32.mrf.mxu1 }
 0x5e9   : > { %v1618_v4 = vpop.f32.mrf.mxu1 }
 0x66e   : > { %v1190_v5 = vpop.xlane.xlu0 %1189 }
 0x66f   : > { %v1191_v6 = vsub.f32 %v1182_v0, %v1190_v5 }
 0x671   : > { %v1192_v7 = vmul.f32 1.442695, %v1191_v6 }
 0x673   : > { %1688 = vpow2.f32 %v1192_v7 }
 0x680   : > { %v1689_v8 = vpop.eup %1688 }
 0x681   : > { %v1194_v9 = vsel %vm990_vm4, %v1689_v8, 0.0 }
 0x682   : > { %1195 = vadd.xlane.f32.xlu1 %v1194_v9 }
 0x69e   : > { %v1113_v14 = vpop.f32.mrf.mxu0 }
 0x69f   : > { %v1114_v16 = vadd.f32 %v1474_v12, %v1113_v14 }
 0x6a0   : > { %v1609_v17 = vpop.f32.mrf.mxu0 }
 0x6a1   : > { %v1119_v18 = vadd.f32 %v1114_v16, %v1857_v15 }
 0x6a2   : > { %v1116_v19 = vpop.f32.mrf.mxu0 }
 0x6a3   : > { %v1120_v20 = vmul.f32 0.70710677, %v1119_v18 }
 0x6a4   : > { %v1610_v21 = vpop.f32.mrf.mxu0 }
 0x6a5   : > { %v1121_v22 = vadd.f32 %v1120_v20, %v1833_v34 }
 0x6a7   : > { %v1122_v23 = vmul.f32 0.70710677, %v1121_v22 }
 0x6a9   : > { %1123 = vst.msk [vmem:[#allocation2 + $0x8] sm:$0xff] %vm603_vm2, %v1122_v23 }
 0x70b   : > { %v1196_v24 = vpop.xlane.xlu1 %1195 }
 0x70c   : > { %1690 = vrcp.f32 %v1196_v24 }
 0x719   : > { %v1691_v25 = vpop.eup %1690 }
 0x71a   : > { %v1198_v26 = vmul.f32 %v1691_v25, %v1689_v8 }
 0x71c   : > { %v1199_v27 = vpack.c.bf16 %v1198_v26, %v1198_v26 }
 0x71e   : > { %1622 = vmatmul.mubr.msk.bf16.vlgmr.msra.gmra.mxu0 %vm990_vm4, %v1199_v27 }
 0x7de   : > { %v1248_v28 = vpop.f32.mrf.mxu0 }
 0x7df   : > { %v1254_v29 = vpack.c.bf16 %v1248_v28, %v1248_v28 }
 0x7e0   : > { %v1623_v30 = vpop.f32.mrf.mxu0 }
 0x7e1   : > { %1630 = vmatmul.mubr.msk.bf16.vlgmr.msra.gmra.mxu1 %vm603_vm2, %v1254_v29 }
 0x7e2   : > { %v1251_v15 = vpop.f32.mrf.mxu0 }
 0x7e4   : > { %v1624_v31 = vpop.f32.mrf.mxu0 }
 0x8a1   : > { %v1292_v32 = vpop.f32.mrf.mxu1 }
 0x8a2   : > { %v1293_v33 = vadd.f32 %v1474_v12, %v1292_v32 }
 0x8a3   : > { %v1631_v34 = vpop.f32.mrf.mxu1 }
 0x8a4   : > { %v1298_v35 = vadd.f32 %v1293_v33, %v1855_v13 }
 0x8a5   : > { %v1295_v36 = vpop.f32.mrf.mxu1 }
 0x8a6   : > { %v1299_v38 = vmul.f32 0.70710677, %v1298_v35 }
 0x8a7   : > { %v1632_v39 = vpop.f32.mrf.mxu1 }
 0x8a8   : > { %v1300_v40 = vadd.f32 %v1299_v38, %v1836_v37  ;;  %1306 = sbr.rel (%p1490_p6) target bundleno = 2432 (0x980), region = 80 }
 0x8aa   : > { %v1301_v41 = vmul.f32 0.70710677, %v1300_v40 }
 0x8ac   : > { %1302 = vst.msk [vmem:[#allocation2 + $0x18] sm:$0xff] %vm603_vm2, %v1301_v41 }
 0x8ad   : > { %v1692_v42 = vld [vmem:[%s1974_s11 + $0x8] sm:$0xff]   ;;  %v1693_v43 = vld [vmem:[%s1974_s11] sm:$0xff]   ;;  %v1309_v37 = vld [vmem:[#allocation2 + $0x10] sm:$0xff] }
 0x8ae   : > { %1633 = vmatprep.subr.bf16.mxu0 %v1692_v42  ;;  %v1307_v13 = vld [vmem:[#allocation2] sm:$0xff]  ;;  %v1308_v44 = vld [vmem:[#allocation2 + $0x8] sm:$0xff] }
 0x8af   : > { %1634 = vmatpush3.bf16.msra.mxu0 %v1692_v42  ;;  %v1311_v45 = vpack.c.bf16 %v1308_v44, %v1307_v13  ;;  %v1491_v50 = vld [vmem:[%s1975_s12] ss:$0 sm:$0xff] }
 0x8b0   : > { %1635 = vmatprep.subr.bf16.mxu0 %v1693_v43 }
 0x8b1   : > { %1637 = vmatprep.mubr.msk.bf16.mxu0 %vm603_vm2, %v1311_v45 }
 0x8b3   : > { %v1310_v46 = vld [vmem:[#allocation2 + $0x18] sm:$0xff]  ;;  %1636 = vmatpush3.bf16.msra.mxu0 %v1693_v43 }
 0x8b4   : > { %v1312_v47 = vpack.c.bf16 %v1310_v46, %v1309_v37 }
 0x8b6   : > { %1638 = vmatmul.mubr.msk.bf16.vlgmr.msra.gmra.mxu0 %vm603_vm2, %v1312_v47 }
 0x976   : > { %v1639_v48 = vpop.f32.mrf.mxu0 }
 0x978   : > { %v1376_v49 = vpop.f32.mrf.mxu0 }
 0x97a   : > { %v1640_v51 = vpop.f32.mrf.mxu0 }
 0x97b   : > { %v1386_v52 = vadd.f32 %v1640_v51, %v1491_v50 }
 0x97c   : > { %v1378_v53 = vpop.f32.mrf.mxu0 }
 0x97d   : > { %1390 = vst.msk [vmem:[%s1976_s13 + $0x8] sm:$0xff] %vm603_vm2, %v1386_v52  ;;  %v1379_v54 = vadd.f32 %v1491_v50, %v1378_v53 }
 0x97f   : > { %1389 = vst.msk [vmem:[%s1976_s13] sm:$0xff] %vm603_vm2, %v1379_v54 }
 0x980 PF: > { %s23_s25 = sadd.s32 1, %s1700_s25  }
 0x981   : > { %p20_p7 = scmp.ge.s32.totalorder %s23_s25, 4  }
 0x983   :  { %22 = sbr.rel (!%p20_p7) target bundleno = 1 (0x1), region = 113 }

</bundles_post_ra>
